<compile_context>
chip_gen: v6e
topology: v6e:2x2x1
jax: 0.10.0
libtpu: 0.0.40
codegen_flags: <defaults>
</compile_context>

<pallas_src>
import functools

import jax
import jax.numpy as jnp
from jax.experimental import pallas as pl
from jax.experimental.pallas import tpu as pltpu


def _round_up(x, m):
    return ((x + m - 1) // m) * m


def _layernorm(x, g, b, eps):
    mean = jnp.mean(x, axis=-1, keepdims=True)
    xc = x - mean
    var = jnp.mean(xc * xc, axis=-1, keepdims=True)
    return xc * jax.lax.rsqrt(var + eps) * g.astype(jnp.float32) + b.astype(jnp.float32)


# ----------------------------------------------------------------------------
# Fully-fused ViT kernel: grid = (batch, depth)
# ----------------------------------------------------------------------------

def _vit_kernel(patches_ref, patch_w_ref, patch_b_ref, cls_ref, pos_ref,
                ln1_g_ref, ln1_b_ref, wqkv_ref, bqkv_ref, wo_ref, bo_ref,
                ln2_g_ref, ln2_b_ref, w1_ref, b1_ref, w2_ref, b2_ref,
                head_g_ref, head_b_ref, head_w_ref, head_bias_ref,
                out_ref, tok_ref, *, num_heads, eps):
    layer = pl.program_id(1)
    n_layers = pl.num_programs(1)
    S, D = tok_ref.shape
    dh = D // num_heads
    scale = 1.0 / float(dh) ** 0.5

    # ---- layer-0 prologue: patch embedding + class token + pos encoding ----
    @pl.when(layer == 0)
    def _():
        p = patches_ref[0]                                       # [N, C*ps*ps] bf16
        y = jnp.dot(p, patch_w_ref[...],
                    preferred_element_type=jnp.float32)
        y = y + patch_b_ref[...].astype(jnp.float32)             # [N, D]
        pos = pos_ref[...].astype(jnp.float32)                   # [S, D]
        # Two disjoint stores instead of a sublane concatenate.
        tok_ref[0:1, :] = cls_ref[...].astype(jnp.float32) + pos[0:1, :]
        tok_ref[1:, :] = y + pos[1:, :]

    # ---- one pre-norm encoder layer (weights indexed by the depth axis) ----
    x = tok_ref[...]                                             # [S, D] f32

    h1 = _layernorm(x, ln1_g_ref[0], ln1_b_ref[0], eps)
    qkv = jnp.dot(h1.astype(jnp.bfloat16), wqkv_ref[0],
                  preferred_element_type=jnp.float32)
    qkv = qkv + bqkv_ref[0].astype(jnp.float32)                  # [S, 3D]

    heads = []
    for h in range(num_heads):                                   # static unroll
        q_h = qkv[:, h * dh:(h + 1) * dh].astype(jnp.bfloat16)
        k_h = qkv[:, D + h * dh:D + (h + 1) * dh].astype(jnp.bfloat16)
        v_h = qkv[:, 2 * D + h * dh:2 * D + (h + 1) * dh].astype(jnp.bfloat16)
        s = jax.lax.dot_general(q_h, k_h, (((1,), (1,)), ((), ())),
                                preferred_element_type=jnp.float32) * scale
        m = jnp.max(s, axis=-1, keepdims=True)
        e = jnp.exp(s - m)
        denom = jnp.sum(e, axis=-1, keepdims=True)
        pr = e * pl.reciprocal(denom, approx=False)
        heads.append(jnp.dot(pr.astype(jnp.bfloat16), v_h,
                             preferred_element_type=jnp.float32))
    attn = jnp.concatenate(heads, axis=-1)                       # [S, D]

    proj = jnp.dot(attn.astype(jnp.bfloat16), wo_ref[0],
                   preferred_element_type=jnp.float32)
    x = x + proj + bo_ref[0].astype(jnp.float32)

    h2 = _layernorm(x, ln2_g_ref[0], ln2_b_ref[0], eps)
    f1 = jnp.dot(h2.astype(jnp.bfloat16), w1_ref[0],
                 preferred_element_type=jnp.float32)
    f1 = jax.nn.gelu(f1 + b1_ref[0].astype(jnp.float32), approximate=True)
    f2 = jnp.dot(f1.astype(jnp.bfloat16), w2_ref[0],
                 preferred_element_type=jnp.float32)
    x = x + f2 + b2_ref[0].astype(jnp.float32)
    tok_ref[...] = x

    # ---- last-layer epilogue: LN + classifier head on the CLS token --------
    @pl.when(layer == n_layers - 1)
    def _():
        cls_tok = x[0:1, :]                                      # [1, D]
        hln = _layernorm(cls_tok, head_g_ref[...], head_b_ref[...], eps)
        logits = jnp.dot(hln.astype(jnp.bfloat16), head_w_ref[...],
                         preferred_element_type=jnp.float32)
        logits = logits + head_bias_ref[...].astype(jnp.float32)
        out_ref[0] = logits.astype(out_ref.dtype)                # [1, NC_pad]


# ----------------------------------------------------------------------------
# Wrapper
# ----------------------------------------------------------------------------

def vit_forward(images, params, *, patch_size, num_heads, eps=1e-5):
    B, C, H, W = images.shape
    ps = patch_size
    nph, npw = H // ps, W // ps
    N = nph * npw
    Cpp = C * ps * ps
    D = params["patch_w"].shape[1]
    F = params["w1"].shape[2]
    S = N + 1
    L = params["wqkv"].shape[0]
    nc = params["head_w"].shape[1]
    nc_pad = max(128, _round_up(nc, 128))

    # Conv2d(3, D, k=ps, s=ps) unfolded into a patch matmul; bf16 DMA traffic.
    patches = images.reshape(B, C, nph, ps, npw, ps)
    patches = patches.transpose(0, 2, 4, 1, 3, 5).reshape(B, N, Cpp)
    patches = patches.astype(jnp.bfloat16)

    head_w = jnp.pad(params["head_w"], ((0, 0), (0, nc_pad - nc)))
    head_bias = jnp.pad(params["head_b"], ((0, 0), (0, nc_pad - nc)))

    def const_spec(shape):
        n = len(shape)
        return pl.BlockSpec(shape, lambda b, l: (0,) * n)

    def layer_spec(shape):
        n = len(shape)
        return pl.BlockSpec(shape, lambda b, l: (l,) + (0,) * (n - 1))

    in_specs = [
        pl.BlockSpec((1, N, Cpp), lambda b, l: (b, 0, 0)),   # patches (per-batch)
        const_spec((Cpp, D)),                                # patch_w
        const_spec((1, D)),                                  # patch_b
        const_spec((1, D)),                                  # cls token
        const_spec((S, D)),                                  # positional encoding
        layer_spec((1, 1, D)),                               # ln1_g
        layer_spec((1, 1, D)),                               # ln1_b
        layer_spec((1, D, 3 * D)),                           # wqkv
        layer_spec((1, 1, 3 * D)),                           # bqkv
        layer_spec((1, D, D)),                               # wo
        layer_spec((1, 1, D)),                               # bo
        layer_spec((1, 1, D)),                               # ln2_g
        layer_spec((1, 1, D)),                               # ln2_b
        layer_spec((1, D, F)),                               # w1
        layer_spec((1, 1, F)),                               # b1
        layer_spec((1, F, D)),                               # w2
        layer_spec((1, 1, D)),                               # b2
        const_spec((1, D)),                                  # head ln gamma
        const_spec((1, D)),                                  # head ln beta
        const_spec((D, nc_pad)),                             # head weight (padded)
        const_spec((1, nc_pad)),                             # head bias (padded)
    ]

    kern = functools.partial(_vit_kernel, num_heads=num_heads, eps=eps)

    out = pl.pallas_call(
        kern,
        out_shape=jax.ShapeDtypeStruct((B, 1, nc_pad), jnp.float32),
        grid=(B, L),
        in_specs=in_specs,
        out_specs=pl.BlockSpec((1, 1, nc_pad), lambda b, l: (b, 0, 0)),
        scratch_shapes=[pltpu.VMEM((S, D), jnp.float32)],    # carried token state
        compiler_params=pltpu.CompilerParams(
            dimension_semantics=("parallel", "arbitrary")),
    )(patches, params["patch_w"], params["patch_b"], params["cls"],
      params["pos"], params["ln1_g"], params["ln1_b"], params["wqkv"],
      params["bqkv"], params["wo"], params["bo"], params["ln2_g"],
      params["ln2_b"], params["w1"], params["b1"], params["w2"], params["b2"],
      params["head_ln_g"], params["head_ln_b"], head_w, head_bias)

    return out.reshape(B, nc_pad)[:, :nc]


# ----------------------------------------------------------------------------
# Parameter construction (deterministic, synthetic; per-layer weights stacked)
# ----------------------------------------------------------------------------

def init_vit_params(key, *, patch_size, embed_dim, ffn_dim, depth, num_classes,
                    num_patches):
    D, F = embed_dim, ffn_dim
    S = num_patches + 1
    Cpp = 3 * patch_size * patch_size

    keys = iter(jax.random.split(key, 16))

    def w(shape):   # MXU weights stored bf16
        return (0.02 * jax.random.normal(next(keys), shape,
                                         dtype=jnp.float32)).astype(jnp.bfloat16)

    def f(shape):   # biases / tokens stay f32
        return (0.02 * jax.random.normal(next(keys), shape,
                                         dtype=jnp.float32)).astype(jnp.float32)

    return {
        "patch_w": w((Cpp, D)),
        "patch_b": f((1, D)),
        "cls": f((1, D)),
        "pos": f((S, D)),
        "ln1_g": jnp.ones((depth, 1, D), jnp.float32),
        "ln1_b": jnp.zeros((depth, 1, D), jnp.float32),
        "wqkv": w((depth, D, 3 * D)),       # fused Q|K|V
        "bqkv": f((depth, 1, 3 * D)),
        "wo": w((depth, D, D)),
        "bo": f((depth, 1, D)),
        "ln2_g": jnp.ones((depth, 1, D), jnp.float32),
        "ln2_b": jnp.zeros((depth, 1, D), jnp.float32),
        "w1": w((depth, D, F)),
        "b1": f((depth, 1, F)),
        "w2": w((depth, F, D)),
        "b2": f((depth, 1, D)),
        "head_ln_g": jnp.ones((1, D), jnp.float32),
        "head_ln_b": jnp.zeros((1, D), jnp.float32),
        "head_w": w((D, num_classes)),
        "head_b": f((1, num_classes)),
    }


# ----------------------------------------------------------------------------
# Main
# ----------------------------------------------------------------------------

if __name__ == "__main__":
    image_size = 16
    patch_size = 4
    embed_dim = 32
    dropout_rate = 0.0      # identity (eval mode)
    num_heads = 4
    ffn_dim = 64
    depth = 2
    num_classes = 10
    batch = 2

    num_patches = (image_size // patch_size) ** 2

    key = jax.random.PRNGKey(0)
    k_img, k_par = jax.random.split(key)
    images = jax.random.normal(
        k_img, (batch, 3, image_size, image_size), dtype=jnp.float32)

    params = init_vit_params(
        k_par, patch_size=patch_size, embed_dim=embed_dim, ffn_dim=ffn_dim,
        depth=depth, num_classes=num_classes, num_patches=num_patches)

    fwd = jax.jit(functools.partial(
        vit_forward, patch_size=patch_size, num_heads=num_heads))

    out = fwd(images, params)
    jax.block_until_ready(out)
    assert out.shape == (batch, num_classes), out.shape
    assert bool(jnp.isfinite(out).all())
    print("KERNEL_OK")
</pallas_src>

<mosaic_0001>
module attributes {stable_mosaic.version = 11 : i64} {
  func.func @_vit_kernel(%arg0: i32, %arg1: i32, %arg2: memref<1x16x48xbf16, #tpu.memory_space<vmem>>, %arg3: memref<48x32xbf16, #tpu.memory_space<vmem>>, %arg4: memref<1x32xf32, #tpu.memory_space<vmem>>, %arg5: memref<1x32xf32, #tpu.memory_space<vmem>>, %arg6: memref<17x32xf32, #tpu.memory_space<vmem>>, %arg7: memref<1x1x32xf32, #tpu.memory_space<vmem>>, %arg8: memref<1x1x32xf32, #tpu.memory_space<vmem>>, %arg9: memref<1x32x96xbf16, #tpu.memory_space<vmem>>, %arg10: memref<1x1x96xf32, #tpu.memory_space<vmem>>, %arg11: memref<1x32x32xbf16, #tpu.memory_space<vmem>>, %arg12: memref<1x1x32xf32, #tpu.memory_space<vmem>>, %arg13: memref<1x1x32xf32, #tpu.memory_space<vmem>>, %arg14: memref<1x1x32xf32, #tpu.memory_space<vmem>>, %arg15: memref<1x32x64xbf16, #tpu.memory_space<vmem>>, %arg16: memref<1x1x64xf32, #tpu.memory_space<vmem>>, %arg17: memref<1x64x32xbf16, #tpu.memory_space<vmem>>, %arg18: memref<1x1x32xf32, #tpu.memory_space<vmem>>, %arg19: memref<1x32xf32, #tpu.memory_space<vmem>>, %arg20: memref<1x32xf32, #tpu.memory_space<vmem>>, %arg21: memref<32x128xbf16, #tpu.memory_space<vmem>>, %arg22: memref<1x128xf32, #tpu.memory_space<vmem>>, %arg23: memref<1x1x128xf32, #tpu.memory_space<vmem>>, %arg24: memref<17x32xf32, #tpu.memory_space<vmem>>) attributes {dimension_semantics = [#tpu.dimension_semantics<parallel>, #tpu.dimension_semantics<arbitrary>], iteration_bounds = array<i64: 2, 2>, scalar_prefetch = 0 : i64, scratch_operands = 1 : i64, tpu.core_type = #tpu.core_type<tc>, window_params = [{transform_indices = @transform_0, window_bounds = array<i64: 1, 16, 48>}, {pipeline_mode = #tpu.pipeline_mode<synchronous>, transform_indices = @transform_1, window_bounds = array<i64: 48, 32>}, {pipeline_mode = #tpu.pipeline_mode<synchronous>, transform_indices = @transform_2, window_bounds = array<i64: 1, 32>}, {pipeline_mode = #tpu.pipeline_mode<synchronous>, transform_indices = @transform_3, window_bounds = array<i64: 1, 32>}, {pipeline_mode = #tpu.pipeline_mode<synchronous>, transform_indices = @transform_4, window_bounds = array<i64: 17, 32>}, {transform_indices = @transform_5, window_bounds = array<i64: 1, 1, 32>}, {transform_indices = @transform_6, window_bounds = array<i64: 1, 1, 32>}, {transform_indices = @transform_7, window_bounds = array<i64: 1, 32, 96>}, {transform_indices = @transform_8, window_bounds = array<i64: 1, 1, 96>}, {transform_indices = @transform_9, window_bounds = array<i64: 1, 32, 32>}, {transform_indices = @transform_10, window_bounds = array<i64: 1, 1, 32>}, {transform_indices = @transform_11, window_bounds = array<i64: 1, 1, 32>}, {transform_indices = @transform_12, window_bounds = array<i64: 1, 1, 32>}, {transform_indices = @transform_13, window_bounds = array<i64: 1, 32, 64>}, {transform_indices = @transform_14, window_bounds = array<i64: 1, 1, 64>}, {transform_indices = @transform_15, window_bounds = array<i64: 1, 64, 32>}, {transform_indices = @transform_16, window_bounds = array<i64: 1, 1, 32>}, {pipeline_mode = #tpu.pipeline_mode<synchronous>, transform_indices = @transform_17, window_bounds = array<i64: 1, 32>}, {pipeline_mode = #tpu.pipeline_mode<synchronous>, transform_indices = @transform_18, window_bounds = array<i64: 1, 32>}, {pipeline_mode = #tpu.pipeline_mode<synchronous>, transform_indices = @transform_19, window_bounds = array<i64: 32, 128>}, {pipeline_mode = #tpu.pipeline_mode<synchronous>, transform_indices = @transform_20, window_bounds = array<i64: 1, 128>}, {transform_indices = @transform_21, window_bounds = array<i64: 1, 1, 128>}]} {
    %c0_i32 = arith.constant 0 : i32
    %0 = arith.cmpi eq, %arg1, %c0_i32 : i32
    %1 = arith.extui %0 : i1 to i32
    %c0_i32_0 = arith.constant 0 : i32
    %2 = arith.cmpi ne, %1, %c0_i32_0 : i32
    scf.if %2 {
      %c0_78 = arith.constant 0 : index
      %c0_79 = arith.constant 0 : index
      %c0_80 = arith.constant 0 : index
      %188 = vector.load %arg2[%c0_78, %c0_79, %c0_80] : memref<1x16x48xbf16, #tpu.memory_space<vmem>>, vector<1x16x48xbf16>
      %189 = vector.shape_cast %188 : vector<1x16x48xbf16> to vector<16x48xbf16>
      %c0_81 = arith.constant 0 : index
      %c0_82 = arith.constant 0 : index
      %190 = vector.load %arg3[%c0_81, %c0_82] : memref<48x32xbf16, #tpu.memory_space<vmem>>, vector<48x32xbf16>
      %cst_83 = arith.constant dense<0.000000e+00> : vector<16x32xf32>
      %191 = tpu.matmul %189, %190, %cst_83 {dimension_numbers = #tpu.dot_dimension_numbers<[1], [0], [0], [1], [0, 0, 1, 1], [], []>} : vector<16x48xbf16>, vector<48x32xbf16>, vector<16x32xf32> -> vector<16x32xf32>
      %c0_84 = arith.constant 0 : index
      %c0_85 = arith.constant 0 : index
      %192 = vector.load %arg4[%c0_84, %c0_85] : memref<1x32xf32, #tpu.memory_space<vmem>>, vector<1x32xf32>
      %193 = vector.broadcast %192 : vector<1x32xf32> to vector<16x32xf32>
      %194 = arith.addf %191, %193 : vector<16x32xf32>
      %c0_86 = arith.constant 0 : index
      %c0_87 = arith.constant 0 : index
      %195 = vector.load %arg6[%c0_86, %c0_87] : memref<17x32xf32, #tpu.memory_space<vmem>>, vector<17x32xf32>
      %c0_88 = arith.constant 0 : index
      %c0_89 = arith.constant 0 : index
      %196 = vector.load %arg5[%c0_88, %c0_89] : memref<1x32xf32, #tpu.memory_space<vmem>>, vector<1x32xf32>
      %197 = vector.extract_strided_slice %195 {offsets = [0, 0], sizes = [1, 32], strides = [1, 1]} : vector<17x32xf32> to vector<1x32xf32>
      %198 = arith.addf %196, %197 : vector<1x32xf32>
      %c0_90 = arith.constant 0 : index
      %c0_91 = arith.constant 0 : index
      %199 = vector.load %arg24[%c0_90, %c0_91] : memref<17x32xf32, #tpu.memory_space<vmem>>, vector<1x32xf32>
      tpu.vector_store %arg24[%c0_90, %c0_91], %198 {strides = array<i32>} : memref<17x32xf32, #tpu.memory_space<vmem>>, vector<1x32xf32>,
      %200 = vector.extract_strided_slice %195 {offsets = [1, 0], sizes = [16, 32], strides = [1, 1]} : vector<17x32xf32> to vector<16x32xf32>
      %201 = arith.addf %194, %200 : vector<16x32xf32>
      %c1 = arith.constant 1 : index
      %c0_92 = arith.constant 0 : index
      %202 = vector.load %arg24[%c1, %c0_92] : memref<17x32xf32, #tpu.memory_space<vmem>>, vector<16x32xf32>
      tpu.vector_store %arg24[%c1, %c0_92], %201 {strides = array<i32>} : memref<17x32xf32, #tpu.memory_space<vmem>>, vector<16x32xf32>,
    } else {
    }
    %c0 = arith.constant 0 : index
    %c0_1 = arith.constant 0 : index
    %3 = vector.load %arg24[%c0, %c0_1] : memref<17x32xf32, #tpu.memory_space<vmem>>, vector<17x32xf32>
    %c0_2 = arith.constant 0 : index
    %c0_3 = arith.constant 0 : index
    %c0_4 = arith.constant 0 : index
    %4 = vector.load %arg7[%c0_2, %c0_3, %c0_4] : memref<1x1x32xf32, #tpu.memory_space<vmem>>, vector<1x1x32xf32>
    %5 = vector.shape_cast %4 : vector<1x1x32xf32> to vector<1x32xf32>
    %c0_5 = arith.constant 0 : index
    %c0_6 = arith.constant 0 : index
    %c0_7 = arith.constant 0 : index
    %6 = vector.load %arg8[%c0_5, %c0_6, %c0_7] : memref<1x1x32xf32, #tpu.memory_space<vmem>>, vector<1x1x32xf32>
    %7 = vector.shape_cast %6 : vector<1x1x32xf32> to vector<1x32xf32>
    %cst = arith.constant dense<0.000000e+00> : vector<17xf32>
    %8 = vector.multi_reduction <add>, %3, %cst [1] : vector<17x32xf32> to vector<17xf32>
    %9 = vector.shape_cast %8 : vector<17xf32> to vector<17x1xf32>
    %cst_8 = arith.constant 3.200000e+01 : f32
    %10 = vector.broadcast %cst_8 : f32 to vector<17x1xf32>
    %11 = arith.divf %9, %10 : vector<17x1xf32>
    %12 = vector.broadcast %11 : vector<17x1xf32> to vector<17x32xf32>
    %13 = arith.subf %3, %12 : vector<17x32xf32>
    %14 = arith.mulf %13, %13 : vector<17x32xf32>
    %cst_9 = arith.constant dense<0.000000e+00> : vector<17xf32>
    %15 = vector.multi_reduction <add>, %14, %cst_9 [1] : vector<17x32xf32> to vector<17xf32>
    %16 = vector.shape_cast %15 : vector<17xf32> to vector<17x1xf32>
    %cst_10 = arith.constant 3.200000e+01 : f32
    %17 = vector.broadcast %cst_10 : f32 to vector<17x1xf32>
    %18 = arith.divf %16, %17 : vector<17x1xf32>
    %cst_11 = arith.constant 9.99999974E-6 : f32
    %19 = vector.broadcast %cst_11 : f32 to vector<17x1xf32>
    %20 = arith.addf %18, %19 : vector<17x1xf32>
    %21 = math.rsqrt %20 : vector<17x1xf32>
    %22 = vector.broadcast %21 : vector<17x1xf32> to vector<17x32xf32>
    %23 = arith.mulf %13, %22 : vector<17x32xf32>
    %24 = vector.broadcast %5 : vector<1x32xf32> to vector<17x32xf32>
    %25 = arith.mulf %23, %24 : vector<17x32xf32>
    %26 = vector.broadcast %7 : vector<1x32xf32> to vector<17x32xf32>
    %27 = arith.addf %25, %26 : vector<17x32xf32>
    %28 = arith.truncf %27 : vector<17x32xf32> to vector<17x32xbf16>
    %c0_12 = arith.constant 0 : index
    %c0_13 = arith.constant 0 : index
    %c0_14 = arith.constant 0 : index
    %29 = vector.load %arg9[%c0_12, %c0_13, %c0_14] : memref<1x32x96xbf16, #tpu.memory_space<vmem>>, vector<1x32x96xbf16>
    %30 = vector.shape_cast %29 : vector<1x32x96xbf16> to vector<32x96xbf16>
    %cst_15 = arith.constant dense<0.000000e+00> : vector<17x96xf32>
    %31 = tpu.matmul %28, %30, %cst_15 {dimension_numbers = #tpu.dot_dimension_numbers<[1], [0], [0], [1], [0, 0, 1, 1], [], []>} : vector<17x32xbf16>, vector<32x96xbf16>, vector<17x96xf32> -> vector<17x96xf32>
    %c0_16 = arith.constant 0 : index
    %c0_17 = arith.constant 0 : index
    %c0_18 = arith.constant 0 : index
    %32 = vector.load %arg10[%c0_16, %c0_17, %c0_18] : memref<1x1x96xf32, #tpu.memory_space<vmem>>, vector<1x1x96xf32>
    %33 = vector.shape_cast %32 : vector<1x1x96xf32> to vector<1x96xf32>
    %34 = vector.broadcast %33 : vector<1x96xf32> to vector<17x96xf32>
    %35 = arith.addf %31, %34 : vector<17x96xf32>
    %36 = vector.extract_strided_slice %35 {offsets = [0, 0], sizes = [17, 8], strides = [1, 1]} : vector<17x96xf32> to vector<17x8xf32>
    %37 = arith.truncf %36 : vector<17x8xf32> to vector<17x8xbf16>
    %38 = vector.extract_strided_slice %35 {offsets = [0, 32], sizes = [17, 8], strides = [1, 1]} : vector<17x96xf32> to vector<17x8xf32>
    %39 = arith.truncf %38 : vector<17x8xf32> to vector<17x8xbf16>
    %40 = vector.extract_strided_slice %35 {offsets = [0, 64], sizes = [17, 8], strides = [1, 1]} : vector<17x96xf32> to vector<17x8xf32>
    %41 = arith.truncf %40 : vector<17x8xf32> to vector<17x8xbf16>
    %cst_19 = arith.constant dense<0.000000e+00> : vector<17x17xf32>
    %42 = tpu.matmul %37, %39, %cst_19 {dimension_numbers = #tpu.dot_dimension_numbers<[1], [1], [0], [0], [0, 0, 1, 0], [], []>} : vector<17x8xbf16>, vector<17x8xbf16>, vector<17x17xf32> -> vector<17x17xf32>
    %cst_20 = arith.constant 0.353553385 : f32
    %43 = vector.broadcast %cst_20 : f32 to vector<17x17xf32>
    %44 = arith.mulf %42, %43 : vector<17x17xf32>
    %cst_21 = arith.constant dense<0xFF800000> : vector<17xf32>
    %45 = vector.multi_reduction <maximumf>, %44, %cst_21 [1] : vector<17x17xf32> to vector<17xf32>
    %46 = vector.shape_cast %45 : vector<17xf32> to vector<17x1xf32>
    %47 = vector.broadcast %46 : vector<17x1xf32> to vector<17x17xf32>
    %48 = arith.subf %44, %47 : vector<17x17xf32>
    %49 = math.exp %48 : vector<17x17xf32>
    %cst_22 = arith.constant dense<0.000000e+00> : vector<17xf32>
    %50 = vector.multi_reduction <add>, %49, %cst_22 [1] : vector<17x17xf32> to vector<17xf32>
    %51 = vector.shape_cast %50 : vector<17xf32> to vector<17x1xf32>
    %52 = tpu.reciprocal %51 : vector<17x1xf32> -> vector<17x1xf32>
    %53 = vector.broadcast %52 : vector<17x1xf32> to vector<17x17xf32>
    %54 = arith.mulf %49, %53 : vector<17x17xf32>
    %55 = arith.truncf %54 : vector<17x17xf32> to vector<17x17xbf16>
    %cst_23 = arith.constant dense<0.000000e+00> : vector<17x8xf32>
    %56 = tpu.matmul %55, %41, %cst_23 {dimension_numbers = #tpu.dot_dimension_numbers<[1], [0], [0], [1], [0, 0, 1, 1], [], []>} : vector<17x17xbf16>, vector<17x8xbf16>, vector<17x8xf32> -> vector<17x8xf32>
    %57 = vector.extract_strided_slice %35 {offsets = [0, 8], sizes = [17, 8], strides = [1, 1]} : vector<17x96xf32> to vector<17x8xf32>
    %58 = arith.truncf %57 : vector<17x8xf32> to vector<17x8xbf16>
    %59 = vector.extract_strided_slice %35 {offsets = [0, 40], sizes = [17, 8], strides = [1, 1]} : vector<17x96xf32> to vector<17x8xf32>
    %60 = arith.truncf %59 : vector<17x8xf32> to vector<17x8xbf16>
    %61 = vector.extract_strided_slice %35 {offsets = [0, 72], sizes = [17, 8], strides = [1, 1]} : vector<17x96xf32> to vector<17x8xf32>
    %62 = arith.truncf %61 : vector<17x8xf32> to vector<17x8xbf16>
    %cst_24 = arith.constant dense<0.000000e+00> : vector<17x17xf32>
    %63 = tpu.matmul %58, %60, %cst_24 {dimension_numbers = #tpu.dot_dimension_numbers<[1], [1], [0], [0], [0, 0, 1, 0], [], []>} : vector<17x8xbf16>, vector<17x8xbf16>, vector<17x17xf32> -> vector<17x17xf32>
    %cst_25 = arith.constant 0.353553385 : f32
    %64 = vector.broadcast %cst_25 : f32 to vector<17x17xf32>
    %65 = arith.mulf %63, %64 : vector<17x17xf32>
    %cst_26 = arith.constant dense<0xFF800000> : vector<17xf32>
    %66 = vector.multi_reduction <maximumf>, %65, %cst_26 [1] : vector<17x17xf32> to vector<17xf32>
    %67 = vector.shape_cast %66 : vector<17xf32> to vector<17x1xf32>
    %68 = vector.broadcast %67 : vector<17x1xf32> to vector<17x17xf32>
    %69 = arith.subf %65, %68 : vector<17x17xf32>
    %70 = math.exp %69 : vector<17x17xf32>
    %cst_27 = arith.constant dense<0.000000e+00> : vector<17xf32>
    %71 = vector.multi_reduction <add>, %70, %cst_27 [1] : vector<17x17xf32> to vector<17xf32>
    %72 = vector.shape_cast %71 : vector<17xf32> to vector<17x1xf32>
    %73 = tpu.reciprocal %72 : vector<17x1xf32> -> vector<17x1xf32>
    %74 = vector.broadcast %73 : vector<17x1xf32> to vector<17x17xf32>
    %75 = arith.mulf %70, %74 : vector<17x17xf32>
    %76 = arith.truncf %75 : vector<17x17xf32> to vector<17x17xbf16>
    %cst_28 = arith.constant dense<0.000000e+00> : vector<17x8xf32>
    %77 = tpu.matmul %76, %62, %cst_28 {dimension_numbers = #tpu.dot_dimension_numbers<[1], [0], [0], [1], [0, 0, 1, 1], [], []>} : vector<17x17xbf16>, vector<17x8xbf16>, vector<17x8xf32> -> vector<17x8xf32>
    %78 = vector.extract_strided_slice %35 {offsets = [0, 16], sizes = [17, 8], strides = [1, 1]} : vector<17x96xf32> to vector<17x8xf32>
    %79 = arith.truncf %78 : vector<17x8xf32> to vector<17x8xbf16>
    %80 = vector.extract_strided_slice %35 {offsets = [0, 48], sizes = [17, 8], strides = [1, 1]} : vector<17x96xf32> to vector<17x8xf32>
    %81 = arith.truncf %80 : vector<17x8xf32> to vector<17x8xbf16>
    %82 = vector.extract_strided_slice %35 {offsets = [0, 80], sizes = [17, 8], strides = [1, 1]} : vector<17x96xf32> to vector<17x8xf32>
    %83 = arith.truncf %82 : vector<17x8xf32> to vector<17x8xbf16>
    %cst_29 = arith.constant dense<0.000000e+00> : vector<17x17xf32>
    %84 = tpu.matmul %79, %81, %cst_29 {dimension_numbers = #tpu.dot_dimension_numbers<[1], [1], [0], [0], [0, 0, 1, 0], [], []>} : vector<17x8xbf16>, vector<17x8xbf16>, vector<17x17xf32> -> vector<17x17xf32>
    %cst_30 = arith.constant 0.353553385 : f32
    %85 = vector.broadcast %cst_30 : f32 to vector<17x17xf32>
    %86 = arith.mulf %84, %85 : vector<17x17xf32>
    %cst_31 = arith.constant dense<0xFF800000> : vector<17xf32>
    %87 = vector.multi_reduction <maximumf>, %86, %cst_31 [1] : vector<17x17xf32> to vector<17xf32>
    %88 = vector.shape_cast %87 : vector<17xf32> to vector<17x1xf32>
    %89 = vector.broadcast %88 : vector<17x1xf32> to vector<17x17xf32>
    %90 = arith.subf %86, %89 : vector<17x17xf32>
    %91 = math.exp %90 : vector<17x17xf32>
    %cst_32 = arith.constant dense<0.000000e+00> : vector<17xf32>
    %92 = vector.multi_reduction <add>, %91, %cst_32 [1] : vector<17x17xf32> to vector<17xf32>
    %93 = vector.shape_cast %92 : vector<17xf32> to vector<17x1xf32>
    %94 = tpu.reciprocal %93 : vector<17x1xf32> -> vector<17x1xf32>
    %95 = vector.broadcast %94 : vector<17x1xf32> to vector<17x17xf32>
    %96 = arith.mulf %91, %95 : vector<17x17xf32>
    %97 = arith.truncf %96 : vector<17x17xf32> to vector<17x17xbf16>
    %cst_33 = arith.constant dense<0.000000e+00> : vector<17x8xf32>
    %98 = tpu.matmul %97, %83, %cst_33 {dimension_numbers = #tpu.dot_dimension_numbers<[1], [0], [0], [1], [0, 0, 1, 1], [], []>} : vector<17x17xbf16>, vector<17x8xbf16>, vector<17x8xf32> -> vector<17x8xf32>
    %99 = vector.extract_strided_slice %35 {offsets = [0, 24], sizes = [17, 8], strides = [1, 1]} : vector<17x96xf32> to vector<17x8xf32>
    %100 = arith.truncf %99 : vector<17x8xf32> to vector<17x8xbf16>
    %101 = vector.extract_strided_slice %35 {offsets = [0, 56], sizes = [17, 8], strides = [1, 1]} : vector<17x96xf32> to vector<17x8xf32>
    %102 = arith.truncf %101 : vector<17x8xf32> to vector<17x8xbf16>
    %103 = vector.extract_strided_slice %35 {offsets = [0, 88], sizes = [17, 8], strides = [1, 1]} : vector<17x96xf32> to vector<17x8xf32>
    %104 = arith.truncf %103 : vector<17x8xf32> to vector<17x8xbf16>
    %cst_34 = arith.constant dense<0.000000e+00> : vector<17x17xf32>
    %105 = tpu.matmul %100, %102, %cst_34 {dimension_numbers = #tpu.dot_dimension_numbers<[1], [1], [0], [0], [0, 0, 1, 0], [], []>} : vector<17x8xbf16>, vector<17x8xbf16>, vector<17x17xf32> -> vector<17x17xf32>
    %cst_35 = arith.constant 0.353553385 : f32
    %106 = vector.broadcast %cst_35 : f32 to vector<17x17xf32>
    %107 = arith.mulf %105, %106 : vector<17x17xf32>
    %cst_36 = arith.constant dense<0xFF800000> : vector<17xf32>
    %108 = vector.multi_reduction <maximumf>, %107, %cst_36 [1] : vector<17x17xf32> to vector<17xf32>
    %109 = vector.shape_cast %108 : vector<17xf32> to vector<17x1xf32>
    %110 = vector.broadcast %109 : vector<17x1xf32> to vector<17x17xf32>
    %111 = arith.subf %107, %110 : vector<17x17xf32>
    %112 = math.exp %111 : vector<17x17xf32>
    %cst_37 = arith.constant dense<0.000000e+00> : vector<17xf32>
    %113 = vector.multi_reduction <add>, %112, %cst_37 [1] : vector<17x17xf32> to vector<17xf32>
    %114 = vector.shape_cast %113 : vector<17xf32> to vector<17x1xf32>
    %115 = tpu.reciprocal %114 : vector<17x1xf32> -> vector<17x1xf32>
    %116 = vector.broadcast %115 : vector<17x1xf32> to vector<17x17xf32>
    %117 = arith.mulf %112, %116 : vector<17x17xf32>
    %118 = arith.truncf %117 : vector<17x17xf32> to vector<17x17xbf16>
    %cst_38 = arith.constant dense<0.000000e+00> : vector<17x8xf32>
    %119 = tpu.matmul %118, %104, %cst_38 {dimension_numbers = #tpu.dot_dimension_numbers<[1], [0], [0], [1], [0, 0, 1, 1], [], []>} : vector<17x17xbf16>, vector<17x8xbf16>, vector<17x8xf32> -> vector<17x8xf32>
    %120 = tpu.concatenate %56, %77, %98, %119 in 1 : vector<17x8xf32>, vector<17x8xf32>, vector<17x8xf32>, vector<17x8xf32> -> vector<17x32xf32>
    %121 = arith.truncf %120 : vector<17x32xf32> to vector<17x32xbf16>
    %c0_39 = arith.constant 0 : index
    %c0_40 = arith.constant 0 : index
    %c0_41 = arith.constant 0 : index
    %122 = vector.load %arg11[%c0_39, %c0_40, %c0_41] : memref<1x32x32xbf16, #tpu.memory_space<vmem>>, vector<1x32x32xbf16>
    %123 = vector.shape_cast %122 : vector<1x32x32xbf16> to vector<32x32xbf16>
    %cst_42 = arith.constant dense<0.000000e+00> : vector<17x32xf32>
    %124 = tpu.matmul %121, %123, %cst_42 {dimension_numbers = #tpu.dot_dimension_numbers<[1], [0], [0], [1], [0, 0, 1, 1], [], []>} : vector<17x32xbf16>, vector<32x32xbf16>, vector<17x32xf32> -> vector<17x32xf32>
    %125 = arith.addf %3, %124 : vector<17x32xf32>
    %c0_43 = arith.constant 0 : index
    %c0_44 = arith.constant 0 : index
    %c0_45 = arith.constant 0 : index
    %126 = vector.load %arg12[%c0_43, %c0_44, %c0_45] : memref<1x1x32xf32, #tpu.memory_space<vmem>>, vector<1x1x32xf32>
    %127 = vector.shape_cast %126 : vector<1x1x32xf32> to vector<1x32xf32>
    %128 = vector.broadcast %127 : vector<1x32xf32> to vector<17x32xf32>
    %129 = arith.addf %125, %128 : vector<17x32xf32>
    %c0_46 = arith.constant 0 : index
    %c0_47 = arith.constant 0 : index
    %c0_48 = arith.constant 0 : index
    %130 = vector.load %arg13[%c0_46, %c0_47, %c0_48] : memref<1x1x32xf32, #tpu.memory_space<vmem>>, vector<1x1x32xf32>
    %131 = vector.shape_cast %130 : vector<1x1x32xf32> to vector<1x32xf32>
    %c0_49 = arith.constant 0 : index
    %c0_50 = arith.constant 0 : index
    %c0_51 = arith.constant 0 : index
    %132 = vector.load %arg14[%c0_49, %c0_50, %c0_51] : memref<1x1x32xf32, #tpu.memory_space<vmem>>, vector<1x1x32xf32>
    %133 = vector.shape_cast %132 : vector<1x1x32xf32> to vector<1x32xf32>
    %cst_52 = arith.constant dense<0.000000e+00> : vector<17xf32>
    %134 = vector.multi_reduction <add>, %129, %cst_52 [1] : vector<17x32xf32> to vector<17xf32>
    %135 = vector.shape_cast %134 : vector<17xf32> to vector<17x1xf32>
    %cst_53 = arith.constant 3.200000e+01 : f32
    %136 = vector.broadcast %cst_53 : f32 to vector<17x1xf32>
    %137 = arith.divf %135, %136 : vector<17x1xf32>
    %138 = vector.broadcast %137 : vector<17x1xf32> to vector<17x32xf32>
    %139 = arith.subf %129, %138 : vector<17x32xf32>
    %140 = arith.mulf %139, %139 : vector<17x32xf32>
    %cst_54 = arith.constant dense<0.000000e+00> : vector<17xf32>
    %141 = vector.multi_reduction <add>, %140, %cst_54 [1] : vector<17x32xf32> to vector<17xf32>
    %142 = vector.shape_cast %141 : vector<17xf32> to vector<17x1xf32>
    %cst_55 = arith.constant 3.200000e+01 : f32
    %143 = vector.broadcast %cst_55 : f32 to vector<17x1xf32>
    %144 = arith.divf %142, %143 : vector<17x1xf32>
    %cst_56 = arith.constant 9.99999974E-6 : f32
    %145 = vector.broadcast %cst_56 : f32 to vector<17x1xf32>
    %146 = arith.addf %144, %145 : vector<17x1xf32>
    %147 = math.rsqrt %146 : vector<17x1xf32>
    %148 = vector.broadcast %147 : vector<17x1xf32> to vector<17x32xf32>
    %149 = arith.mulf %139, %148 : vector<17x32xf32>
    %150 = vector.broadcast %131 : vector<1x32xf32> to vector<17x32xf32>
    %151 = arith.mulf %149, %150 : vector<17x32xf32>
    %152 = vector.broadcast %133 : vector<1x32xf32> to vector<17x32xf32>
    %153 = arith.addf %151, %152 : vector<17x32xf32>
    %154 = arith.truncf %153 : vector<17x32xf32> to vector<17x32xbf16>
    %c0_57 = arith.constant 0 : index
    %c0_58 = arith.constant 0 : index
    %c0_59 = arith.constant 0 : index
    %155 = vector.load %arg15[%c0_57, %c0_58, %c0_59] : memref<1x32x64xbf16, #tpu.memory_space<vmem>>, vector<1x32x64xbf16>
    %156 = vector.shape_cast %155 : vector<1x32x64xbf16> to vector<32x64xbf16>
    %cst_60 = arith.constant dense<0.000000e+00> : vector<17x64xf32>
    %157 = tpu.matmul %154, %156, %cst_60 {dimension_numbers = #tpu.dot_dimension_numbers<[1], [0], [0], [1], [0, 0, 1, 1], [], []>} : vector<17x32xbf16>, vector<32x64xbf16>, vector<17x64xf32> -> vector<17x64xf32>
    %c0_61 = arith.constant 0 : index
    %c0_62 = arith.constant 0 : index
    %c0_63 = arith.constant 0 : index
    %158 = vector.load %arg16[%c0_61, %c0_62, %c0_63] : memref<1x1x64xf32, #tpu.memory_space<vmem>>, vector<1x1x64xf32>
    %159 = vector.shape_cast %158 : vector<1x1x64xf32> to vector<1x64xf32>
    %160 = vector.broadcast %159 : vector<1x64xf32> to vector<17x64xf32>
    %161 = arith.addf %157, %160 : vector<17x64xf32>
    %162 = arith.mulf %161, %161 : vector<17x64xf32>
    %163 = arith.mulf %161, %162 : vector<17x64xf32>
    %cst_64 = arith.constant 4.471500e-02 : f32
    %164 = vector.broadcast %cst_64 : f32 to vector<17x64xf32>
    %165 = arith.mulf %164, %163 : vector<17x64xf32>
    %166 = arith.addf %161, %165 : vector<17x64xf32>
    %cst_65 = arith.constant 0.797884583 : f32
    %167 = vector.broadcast %cst_65 : f32 to vector<17x64xf32>
    %168 = arith.mulf %167, %166 : vector<17x64xf32>
    %169 = math.tanh %168 : vector<17x64xf32>
    %cst_66 = arith.constant 1.000000e+00 : f32
    %170 = vector.broadcast %cst_66 : f32 to vector<17x64xf32>
    %171 = arith.addf %170, %169 : vector<17x64xf32>
    %cst_67 = arith.constant 5.000000e-01 : f32
    %172 = vector.broadcast %cst_67 : f32 to vector<17x64xf32>
    %173 = arith.mulf %172, %171 : vector<17x64xf32>
    %174 = arith.mulf %161, %173 : vector<17x64xf32>
    %175 = arith.truncf %174 : vector<17x64xf32> to vector<17x64xbf16>
    %c0_68 = arith.constant 0 : index
    %c0_69 = arith.constant 0 : index
    %c0_70 = arith.constant 0 : index
    %176 = vector.load %arg17[%c0_68, %c0_69, %c0_70] : memref<1x64x32xbf16, #tpu.memory_space<vmem>>, vector<1x64x32xbf16>
    %177 = vector.shape_cast %176 : vector<1x64x32xbf16> to vector<64x32xbf16>
    %cst_71 = arith.constant dense<0.000000e+00> : vector<17x32xf32>
    %178 = tpu.matmul %175, %177, %cst_71 {dimension_numbers = #tpu.dot_dimension_numbers<[1], [0], [0], [1], [0, 0, 1, 1], [], []>} : vector<17x64xbf16>, vector<64x32xbf16>, vector<17x32xf32> -> vector<17x32xf32>
    %179 = arith.addf %129, %178 : vector<17x32xf32>
    %c0_72 = arith.constant 0 : index
    %c0_73 = arith.constant 0 : index
    %c0_74 = arith.constant 0 : index
    %180 = vector.load %arg18[%c0_72, %c0_73, %c0_74] : memref<1x1x32xf32, #tpu.memory_space<vmem>>, vector<1x1x32xf32>
    %181 = vector.shape_cast %180 : vector<1x1x32xf32> to vector<1x32xf32>
    %182 = vector.broadcast %181 : vector<1x32xf32> to vector<17x32xf32>
    %183 = arith.addf %179, %182 : vector<17x32xf32>
    %c0_75 = arith.constant 0 : index
    %c0_76 = arith.constant 0 : index
    %184 = vector.load %arg24[%c0_75, %c0_76] : memref<17x32xf32, #tpu.memory_space<vmem>>, vector<17x32xf32>
    tpu.vector_store %arg24[%c0_75, %c0_76], %183 {strides = array<i32>} : memref<17x32xf32, #tpu.memory_space<vmem>>, vector<17x32xf32>,
    %c1_i32 = arith.constant 1 : i32
    %185 = arith.cmpi eq, %arg1, %c1_i32 : i32
    %186 = arith.extui %185 : i1 to i32
    %c0_i32_77 = arith.constant 0 : i32
    %187 = arith.cmpi ne, %186, %c0_i32_77 : i32
    scf.if %187 {
      %188 = vector.extract_strided_slice %183 {offsets = [0, 0], sizes = [1, 32], strides = [1, 1]} : vector<17x32xf32> to vector<1x32xf32>
      %c0_78 = arith.constant 0 : index
      %c0_79 = arith.constant 0 : index
      %189 = vector.load %arg19[%c0_78, %c0_79] : memref<1x32xf32, #tpu.memory_space<vmem>>, vector<1x32xf32>
      %c0_80 = arith.constant 0 : index
      %c0_81 = arith.constant 0 : index
      %190 = vector.load %arg20[%c0_80, %c0_81] : memref<1x32xf32, #tpu.memory_space<vmem>>, vector<1x32xf32>
      %cst_82 = arith.constant dense<0.000000e+00> : vector<1xf32>
      %191 = vector.multi_reduction <add>, %188, %cst_82 [1] : vector<1x32xf32> to vector<1xf32>
      %192 = vector.shape_cast %191 : vector<1xf32> to vector<1x1xf32>
      %cst_83 = arith.constant 3.200000e+01 : f32
      %193 = vector.broadcast %cst_83 : f32 to vector<1x1xf32>
      %194 = arith.divf %192, %193 : vector<1x1xf32>
      %195 = vector.broadcast %194 : vector<1x1xf32> to vector<1x32xf32>
      %196 = arith.subf %188, %195 : vector<1x32xf32>
      %197 = arith.mulf %196, %196 : vector<1x32xf32>
      %cst_84 = arith.constant dense<0.000000e+00> : vector<1xf32>
      %198 = vector.multi_reduction <add>, %197, %cst_84 [1] : vector<1x32xf32> to vector<1xf32>
      %199 = vector.shape_cast %198 : vector<1xf32> to vector<1x1xf32>
      %cst_85 = arith.constant 3.200000e+01 : f32
      %200 = vector.broadcast %cst_85 : f32 to vector<1x1xf32>
      %201 = arith.divf %199, %200 : vector<1x1xf32>
      %cst_86 = arith.constant 9.99999974E-6 : f32
      %202 = vector.broadcast %cst_86 : f32 to vector<1x1xf32>
      %203 = arith.addf %201, %202 : vector<1x1xf32>
      %204 = math.rsqrt %203 : vector<1x1xf32>
      %205 = vector.broadcast %204 : vector<1x1xf32> to vector<1x32xf32>
      %206 = arith.mulf %196, %205 : vector<1x32xf32>
      %207 = arith.mulf %206, %189 : vector<1x32xf32>
      %208 = arith.addf %207, %190 : vector<1x32xf32>
      %209 = arith.truncf %208 : vector<1x32xf32> to vector<1x32xbf16>
      %c0_87 = arith.constant 0 : index
      %c0_88 = arith.constant 0 : index
      %210 = vector.load %arg21[%c0_87, %c0_88] : memref<32x128xbf16, #tpu.memory_space<vmem>>, vector<32x128xbf16>
      %cst_89 = arith.constant dense<0.000000e+00> : vector<1x128xf32>
      %211 = tpu.matmul %209, %210, %cst_89 {dimension_numbers = #tpu.dot_dimension_numbers<[1], [0], [0], [1], [0, 0, 1, 1], [], []>} : vector<1x32xbf16>, vector<32x128xbf16>, vector<1x128xf32> -> vector<1x128xf32>
      %c0_90 = arith.constant 0 : index
      %c0_91 = arith.constant 0 : index
      %212 = vector.load %arg22[%c0_90, %c0_91] : memref<1x128xf32, #tpu.memory_space<vmem>>, vector<1x128xf32>
      %213 = arith.addf %211, %212 : vector<1x128xf32>
      %c0_92 = arith.constant 0 : index
      %c0_93 = arith.constant 0 : index
      %c0_94 = arith.constant 0 : index
      %214 = vector.load %arg23[%c0_92, %c0_93, %c0_94] : memref<1x1x128xf32, #tpu.memory_space<vmem>>, vector<1x1x128xf32>
      %215 = vector.shape_cast %214 : vector<1x1x128xf32> to vector<1x128xf32>
      %216 = vector.shape_cast %213 : vector<1x128xf32> to vector<1x1x128xf32>
      tpu.vector_store %arg23[%c0_92, %c0_93, %c0_94], %216 {strides = array<i32>} : memref<1x1x128xf32, #tpu.memory_space<vmem>>, vector<1x1x128xf32>,
    } else {
    }
    return
  }
  func.func @transform_0(%arg0: i32, %arg1: i32) -> (i32, i32, i32) {
    %c0_i32 = arith.constant 0 : i32
    %c0_i32_0 = arith.constant 0 : i32
    %c0_i32_1 = arith.constant 0 : i32
    return %arg0, %c0_i32, %c0_i32_0 : i32, i32, i32
  }
  func.func @transform_1(%arg0: i32, %arg1: i32) -> (i32, i32) {
    %c0_i32 = arith.constant 0 : i32
    %c0_i32_0 = arith.constant 0 : i32
    %c0_i32_1 = arith.constant 0 : i32
    return %c0_i32, %c0_i32_0 : i32, i32
  }
  func.func @transform_2(%arg0: i32, %arg1: i32) -> (i32, i32) {
    %c0_i32 = arith.constant 0 : i32
    %c0_i32_0 = arith.constant 0 : i32
    %c0_i32_1 = arith.constant 0 : i32
    return %c0_i32, %c0_i32_0 : i32, i32
  }
  func.func @transform_3(%arg0: i32, %arg1: i32) -> (i32, i32) {
    %c0_i32 = arith.constant 0 : i32
    %c0_i32_0 = arith.constant 0 : i32
    %c0_i32_1 = arith.constant 0 : i32
    return %c0_i32, %c0_i32_0 : i32, i32
  }
  func.func @transform_4(%arg0: i32, %arg1: i32) -> (i32, i32) {
    %c0_i32 = arith.constant 0 : i32
    %c0_i32_0 = arith.constant 0 : i32
    %c0_i32_1 = arith.constant 0 : i32
    return %c0_i32, %c0_i32_0 : i32, i32
  }
  func.func @transform_5(%arg0: i32, %arg1: i32) -> (i32, i32, i32) {
    %c0_i32 = arith.constant 0 : i32
    %c0_i32_0 = arith.constant 0 : i32
    %c0_i32_1 = arith.constant 0 : i32
    return %arg1, %c0_i32, %c0_i32_0 : i32, i32, i32
  }
  func.func @transform_6(%arg0: i32, %arg1: i32) -> (i32, i32, i32) {
    %c0_i32 = arith.constant 0 : i32
    %c0_i32_0 = arith.constant 0 : i32
    %c0_i32_1 = arith.constant 0 : i32
    return %arg1, %c0_i32, %c0_i32_0 : i32, i32, i32
  }
  func.func @transform_7(%arg0: i32, %arg1: i32) -> (i32, i32, i32) {
    %c0_i32 = arith.constant 0 : i32
    %c0_i32_0 = arith.constant 0 : i32
    %c0_i32_1 = arith.constant 0 : i32
    return %arg1, %c0_i32, %c0_i32_0 : i32, i32, i32
  }
  func.func @transform_8(%arg0: i32, %arg1: i32) -> (i32, i32, i32) {
    %c0_i32 = arith.constant 0 : i32
    %c0_i32_0 = arith.constant 0 : i32
    %c0_i32_1 = arith.constant 0 : i32
    return %arg1, %c0_i32, %c0_i32_0 : i32, i32, i32
  }
  func.func @transform_9(%arg0: i32, %arg1: i32) -> (i32, i32, i32) {
    %c0_i32 = arith.constant 0 : i32
    %c0_i32_0 = arith.constant 0 : i32
    %c0_i32_1 = arith.constant 0 : i32
    return %arg1, %c0_i32, %c0_i32_0 : i32, i32, i32
  }
  func.func @transform_10(%arg0: i32, %arg1: i32) -> (i32, i32, i32) {
    %c0_i32 = arith.constant 0 : i32
    %c0_i32_0 = arith.constant 0 : i32
    %c0_i32_1 = arith.constant 0 : i32
    return %arg1, %c0_i32, %c0_i32_0 : i32, i32, i32
  }
  func.func @transform_11(%arg0: i32, %arg1: i32) -> (i32, i32, i32) {
    %c0_i32 = arith.constant 0 : i32
    %c0_i32_0 = arith.constant 0 : i32
    %c0_i32_1 = arith.constant 0 : i32
    return %arg1, %c0_i32, %c0_i32_0 : i32, i32, i32
  }
  func.func @transform_12(%arg0: i32, %arg1: i32) -> (i32, i32, i32) {
    %c0_i32 = arith.constant 0 : i32
    %c0_i32_0 = arith.constant 0 : i32
    %c0_i32_1 = arith.constant 0 : i32
    return %arg1, %c0_i32, %c0_i32_0 : i32, i32, i32
  }
  func.func @transform_13(%arg0: i32, %arg1: i32) -> (i32, i32, i32) {
    %c0_i32 = arith.constant 0 : i32
    %c0_i32_0 = arith.constant 0 : i32
    %c0_i32_1 = arith.constant 0 : i32
    return %arg1, %c0_i32, %c0_i32_0 : i32, i32, i32
  }
  func.func @transform_14(%arg0: i32, %arg1: i32) -> (i32, i32, i32) {
    %c0_i32 = arith.constant 0 : i32
    %c0_i32_0 = arith.constant 0 : i32
    %c0_i32_1 = arith.constant 0 : i32
    return %arg1, %c0_i32, %c0_i32_0 : i32, i32, i32
  }
  func.func @transform_15(%arg0: i32, %arg1: i32) -> (i32, i32, i32) {
    %c0_i32 = arith.constant 0 : i32
    %c0_i32_0 = arith.constant 0 : i32
    %c0_i32_1 = arith.constant 0 : i32
    return %arg1, %c0_i32, %c0_i32_0 : i32, i32, i32
  }
  func.func @transform_16(%arg0: i32, %arg1: i32) -> (i32, i32, i32) {
    %c0_i32 = arith.constant 0 : i32
    %c0_i32_0 = arith.constant 0 : i32
    %c0_i32_1 = arith.constant 0 : i32
    return %arg1, %c0_i32, %c0_i32_0 : i32, i32, i32
  }
  func.func @transform_17(%arg0: i32, %arg1: i32) -> (i32, i32) {
    %c0_i32 = arith.constant 0 : i32
    %c0_i32_0 = arith.constant 0 : i32
    %c0_i32_1 = arith.constant 0 : i32
    return %c0_i32, %c0_i32_0 : i32, i32
  }
  func.func @transform_18(%arg0: i32, %arg1: i32) -> (i32, i32) {
    %c0_i32 = arith.constant 0 : i32
    %c0_i32_0 = arith.constant 0 : i32
    %c0_i32_1 = arith.constant 0 : i32
    return %c0_i32, %c0_i32_0 : i32, i32
  }
  func.func @transform_19(%arg0: i32, %arg1: i32) -> (i32, i32) {
    %c0_i32 = arith.constant 0 : i32
    %c0_i32_0 = arith.constant 0 : i32
    %c0_i32_1 = arith.constant 0 : i32
    return %c0_i32, %c0_i32_0 : i32, i32
  }
  func.func @transform_20(%arg0: i32, %arg1: i32) -> (i32, i32) {
    %c0_i32 = arith.constant 0 : i32
    %c0_i32_0 = arith.constant 0 : i32
    %c0_i32_1 = arith.constant 0 : i32
    return %c0_i32, %c0_i32_0 : i32, i32
  }
  func.func @transform_21(%arg0: i32, %arg1: i32) -> (i32, i32, i32) {
    %c0_i32 = arith.constant 0 : i32
    %c0_i32_0 = arith.constant 0 : i32
    %c0_i32_1 = arith.constant 0 : i32
    return %arg0, %c0_i32, %c0_i32_0 : i32, i32, i32
  }
}

</mosaic_0001>

<bundles_post_ra>
// kernel: vit_forward.1
= control target key start
LH: loop header
LB: loop body
LE: loop exit
PB: predicated region body
PF: predicated region fallthrough
CT: control target
= control target key end

     0   :  { %s3591_s0 = inlined_call_operand.vmem [shape: bf16[2,16,48], index: 0, kind: input, shape index: {}]   ;;  %s3592_s1 = inlined_call_operand.vmem [shape: bf16[48,32], index: 1, kind: input, shape index: {}]   ;;  %s3593_s2 = inlined_call_operand.vmem [shape: f32[1,32], index: 2, kind: input, shape index: {}]   ;;  %s3594_s3 = inlined_call_operand.vmem [shape: f32[1,32], index: 3, kind: input, shape index: {}]   ;;  %s3595_s4 = inlined_call_operand.vmem [shape: f32[17,32], index: 4, kind: input, shape index: {}]   ;;  %s3596_s5 = inlined_call_operand.vmem [shape: f32[2,1,32], index: 5, kind: input, shape index: {}]   ;;  %s3597_s6 = inlined_call_operand.vmem [shape: f32[2,1,32], index: 6, kind: input, shape index: {}]   ;;  %s3598_s7 = inlined_call_operand.vmem [shape: bf16[2,32,96], index: 7, kind: input, shape index: {}]   ;;  %s3599_s8 = inlined_call_operand.vmem [shape: f32[2,1,96], index: 8, kind: input, shape index: {}]   ;;  %s3600_s9 = inlined_call_operand.vmem [shape: bf16[2,32,32], index: 9, kind: input, shape index: {}]   ;;  %s3601_s10 = inlined_call_operand.vmem [shape: f32[2,1,32], index: 10, kind: input, shape index: {}]   ;;  %s3602_s11 = inlined_call_operand.vmem [shape: f32[2,1,32], index: 11, kind: input, shape index: {}]   ;;  %s3603_s12 = inlined_call_operand.vmem [shape: f32[2,1,32], index: 12, kind: input, shape index: {}]   ;;  %s3604_s13 = inlined_call_operand.vmem [shape: bf16[2,32,64], index: 13, kind: input, shape index: {}]   ;;  %s3605_s14 = inlined_call_operand.vmem [shape: f32[2,1,64], index: 14, kind: input, shape index: {}]   ;;  %s3606_s15 = inlined_call_operand.vmem [shape: bf16[2,64,32], index: 15, kind: input, shape index: {}]   ;;  %s3607_s16 = inlined_call_operand.vmem [shape: f32[2,1,32], index: 16, kind: input, shape index: {}]   ;;  %s3608_s17 = inlined_call_operand.vmem [shape: f32[1,32], index: 17, kind: input, shape index: {}]   ;;  %s3609_s18 = inlined_call_operand.vmem [shape: f32[1,32], index: 18, kind: input, shape index: {}]   ;;  %s3610_s19 = inlined_call_operand.vmem [shape: bf16[32,128], index: 19, kind: input, shape index: {}]   ;;  %s3611_s20 = inlined_call_operand.vmem [shape: f32[1,128], index: 20, kind: input, shape index: {}]   ;;  %s3612_s21 = inlined_call_operand.hbm [shape: f32[2,1,128], index: 21, kind: output, shape index: {}]  }
   0x1   :  { %3629 = sst [smem:[#allocation18_spill]] %s3591_s0 }
   0x2   :  { %3630 = sst [smem:[#allocation19_spill]] %s3592_s1 }
   0x3   :  { %3631 = sst [smem:[#allocation20_spill]] %s3593_s2 }
   0x4   :  { %3632 = sst [smem:[#allocation21_spill]] %s3594_s3 }
   0x5   :  { %3633 = sst [smem:[#allocation22_spill]] %s3595_s4 }
   0x6   :  { %3634 = sst [smem:[#allocation23_spill]] %s3596_s5 }
   0x7   :  { %3635 = sst [smem:[#allocation24_spill]] %s3598_s7 }
   0x8   :  { %3636 = sst [smem:[#allocation25_spill]] %s3600_s9 }
   0x9   :  { %3637 = sst [smem:[#allocation26_spill]] %s3608_s17 }
   0xa   :  { %3638 = sst [smem:[#allocation27_spill]] %s3609_s18 }
   0xb   :  { %3639 = sst [smem:[#allocation28_spill]] %s3610_s19 }
   0xc   :  { %3640 = sst [smem:[#allocation29_spill]] %s3611_s20 }
   0xd   :  { %3641 = sst [smem:[#allocation30_spill]] %s3612_s21 }
   0xe   :  { %26 = vsyncpa [#allocation4], 0 }
   0xf   :  { %28 = vsyncpa [#allocation4 + $0x1], 0  ;;  %s3147_s2 = smov 0   ;;  %s3149_s25 = smov 0  }
  0x10   :  { %s3151_s26 = smov 0   ;;  %s3153_s27 = smov 0  }
  0x11   :  { %s3155_s3 = smov 0   ;;  %s3157_s28 = smov 0  }
  0x12   :  { %s3159_s29 = smov 0   ;;  %s3161_s0 = smov 0  }
  0x13 LB: > { %3642 = sst [smem:[#allocation6_spill]] %s2987_s2  ;;  %s2475_s4 = sadd.s32 4294967295, %s3015_s0   ;;  %s3015_s0 = sphi %s3161_s0, %s34_s0   ;;  %s3011_s29 = sphi %s3159_s29, %s3692_s29   ;;  %s3007_s28 = sphi %s3157_s28, %s3688_s28   ;;  %s3003_s3 = sphi %s3155_s3, %s3687_s3   ;;  %s2999_s27 = sphi %s3153_s27, %s3686_s27   ;;  %s2995_s26 = sphi %s3151_s26, %s3685_s26   ;;  %s2991_s25 = sphi %s3149_s25, %s3691_s25   ;;  %s2987_s2 = sphi %s3147_s2, %s3690_s2  }
  0x14   : > { %3643 = sst [smem:[#allocation7_spill]] %s2995_s26  ;;  %s2476_s30 = sadd.s32 4294967294, %s3015_s0  }
  0x15   : > { %3644 = sst [smem:[#allocation8_spill]] %s2999_s27  ;;  %s43_s5 = sadd.s32 1, %s3007_s28 }
  0x16   : > { %3645 = sst [smem:[#allocation9_spill]] %s3003_s3  ;;  %p44_p0 = scmp.ge.s32.totalorder %s43_s5, 2 }
  0x17   : > { %3646 = sst [smem:[#allocation10_spill]] %s3007_s28  ;;  %s46_s22 = sadd.s32 1, %s3011_s29 }
  0x18   : > { %3647 = sst [smem:[#allocation11_spill]] %s3011_s29  ;;  %p569_p1 = scmp.ne.s32.totalorder %s2995_s26, %s2991_s25 }
  0x19   : > { %3648 = sst [smem:[#allocation12_spill]] %s3015_s0  ;;  %p570_p2 = scmp.eq.s32.totalorder %s2475_s4, 3 }
  0x1a   : > { %s3694_s5 = smov (%p44_p0, %s43_s5), 0  ;;  %s3696_s22 = smov (!%p44_p0, %s46_s22), %s3011_s29 }
  0x1b   : > { %3649 = sst [smem:[#allocation13_spill]] %s3694_s5  ;;  %p3196_p3 = por %p570_p2, %p569_p1 }
  0x1c   : > { %p575_p4 = scmp.ne.s32.totalorder %s2991_s25, %s2987_s2  ;;  %p48_p5 = scmp.ge.s32.totalorder %s3696_s22, 2 }
  0x1d   : > { %s3650_s23 = scalar_select %p3196_p3, 1, 0 }
  0x1e   : > { %p576_p6 = scmp.eq.s32.totalorder %s2476_s30, 3  ;;  %p2479_p7 = scmp.ge.s32.totalorder %s3015_s0, 1 }
  0x1f   : > { %3651 = sst [smem:[#allocation14_spill]] %s3650_s23  ;;  %p706_p8 = scmp.lt.s32.totalorder %s3015_s0, 5 }
  0x20   : > { %s3698_s22 = smov (%p48_p5, %s3696_s22), 0  ;;  %p3206_p9 = por %p576_p6, %p575_p4 }
  0x21   : > { %3652 = sst [smem:[#allocation15_spill]] %s3698_s22  ;;  %p707_p10 = pnand %p2479_p7, %p706_p8 }
  0x22   : > { %s3653_s1 = scalar_select %p3206_p9, 1, 0 }
  0x23   : > { %s556_s24 = ssub.s32 %s3011_s29, %s3698_s22  ;;  %s559_s4 = sadd.s32 1, %s2995_s26 }
  0x24   : > { %3654 = sst [smem:[#allocation16_spill]] %s3653_s1  ;;  %p557_p11 = scmp.eq.s32.totalorder %s556_s24, 0 }
  0x25   : > { %710 = sbr.rel (%p707_p10) target bundleno = 4855 (0x12f7), region = 104  ;;  %p809_p12 = scmp.lt.s32.totalorder (!%p707_p10), %s3003_s3, 1 }
  0x26   : > { %s3214_s5 = scalar_select %p557_p11, %s2995_s26, %s559_s4  }
  0x27   : > { %p814_p13 = scmp.lt.s32.totalorder (!%p707_p10), %s2999_s27, 1  ;;  %s3656_s29 = sld [smem:[#allocation18_spill]] (!%p707_p10) }
  0x28   : > { %3655 = sst [smem:[#allocation17_spill]] %s3214_s5  ;;  %s3660_s17 = sand.u32 (!%p707_p10), 1, %s2991_s25  }
  0x29   : > { %s3658_s7 = sld [smem:[#allocation24_spill]] (!%p707_p10)  ;;  %s3282_s18 = scalar_lea.vmem (!%p707_p10), [#allocation3], %s3660_s17 }
  0x2a   : > { %s810_s28 = scalar_select %p809_p12, %s3003_s3, 1 }
  0x2b   : > { %s3221_s2 = scalar_select %p814_p13, %s2999_s27, 1 }
  0x2c   : > { %s2546_s24 = sshll.u32 %s810_s28, 3  ;;  %s3659_s9 = sld [smem:[#allocation25_spill]] }
  0x2d   : > { %s813_s30 = scalar_lea.vmem %s3656_s29, %s2546_s24  ;;  %s2547_s20 = sshll.u32 %s3221_s2, 4 }
  0x2e   : > { %s841_s0 = scalar_lea.vmem %s3603_s12, %s3221_s2  ;;  %s3264_s28 = scalar_lea.vmem %s3604_s13, %s2547_s20 }
  0x2f   : > { %s3238_s19 = scalar_lea.vmem %s3658_s7, %s2547_s20  ;;  %s849_s22 = scalar_lea.vmem %s3605_s14, %s3221_s2 }
  0x30   : > { %s857_s21 = scalar_lea.vmem %s3607_s16, %s3221_s2  ;;  %s3661_s7 = sld [smem:[#allocation8_spill]] }
  0x32   : > { %s3247_s24 = scalar_lea.vmem %s3659_s9, %s2547_s20  ;;  %s2550_s9 = sshll.u32 %s3221_s2, 5 }
  0x33   : > { %s3278_s3 = scalar_lea.vmem %s3606_s15, %s2550_s9 }
  0x36   : > { %p2490_p0 = scmp.ne.s32.totalorder %s3661_s7, 0 }
  0x37   : > { %s3662_s4 = sld [smem:[#allocation19_spill]] (!%p2490_p0) }
  0x38   : > { %862 = sbr.rel (%p2490_p0) target bundleno = 276 (0x114), region = 108  ;;  %s3663_s17 = sld [smem:[#allocation22_spill]] (!%p2490_p0) }
  0x39   : > { %s3664_s27 = sld [smem:[#allocation21_spill]] (!%p2490_p0) }
  0x3a   : > { %s3665_s1 = sld [smem:[#allocation20_spill]] (!%p2490_p0) }
  0x3d   : > { %v2824_v0 = vld [vmem:[%s3662_s4 + $0x10] sm:$0xff]   ;;  %v3017_v1 = vmov 0.0   ;;  %v2825_v2 = vld [vmem:[%s3662_s4 + $0x8] sm:$0xff]   ;;  %vm3018_vm0 = vmmov 0   ;;  %v2826_v3 = vld [vmem:[%s3662_s4] sm:$0xff]   ;;  %vm901_vm1 = vcmask 392192  }
  0x3e   : > { %2608 = vmatprep.subr.bf16.mxu0 %v3017_v1  ;;  %2614 = vmatprep.mubr.msk.bf16.mxu0 %vm3018_vm0, %v3017_v1  ;;  %v2827_v4 = vld [vmem:[%s813_s30] sm:$0xff]   ;;  %vm951_vm2 = vcmask 253952   ;;  %v947_v8 = vld [vmem:[%s3663_s17 + $0x8] sm:$0xff]  ;;  %vm956_vm3 = vcmask 1046528   ;;  %v948_v11 = vld [vmem:[%s3663_s17 + $0x10] sm:$0x1] }
  0x3f   : > { %2609 = vmatpush3.bf16.msra.mxu0 %v2824_v0  ;;  %v946_v5 = vld [vmem:[%s3663_s17] sm:$0xff]  ;;  %v958_v10 = vrot.slane %v947_v8, 1  ;;  %v960_v15 = vrot.slane %v948_v11, 1  ;;  %vm966_vm4 = vcmask 261120  }
  0x40   : > { %2610 = vmatprep.subr.bf16.mxu0 %v3017_v1  ;;  %v949_v6 = vld [vmem:[%s3664_s27] sm:$0x1]  ;;  %v957_v9 = vrot.slane %v946_v5, 1 }
  0x41   : > { %v950_v7 = vadd.f32 %v949_v6, %v946_v5  ;;  %v2491_v12 = vld [vmem:[%s3665_s1] ss:$0 sm:$0xff]  ;;  %v961_v20 = vsel %vm956_vm3, %v958_v10, %v960_v15 }
  0x42   : > { %v959_v14 = vsel %vm956_vm3, %v957_v9, %v958_v10 }
  0x43   : > { %2611 = vmatpush3.bf16.msra.mxu0 %v2825_v2  ;;  %952 = vst.msk [vmem:[#allocation2] sm:$0x1] %vm951_vm2, %v950_v7 }
  0x44   : > { %2612 = vmatprep.subr.bf16.mxu0 %v3017_v1 }
  0x47   : > { %2613 = vmatpush3.bf16.msra.mxu0 %v2826_v3 }
  0x4a   : > { %2615 = vmatmul.mubr.msk.bf16.vlgmr.msra.gmra.mxu0 %vm901_vm1, %v2827_v4 }
 0x10a   : > { %v939_v13 = vpop.f32.mrf.mxu0 }
 0x10b   : > { %v940_v16 = vadd.f32 %v2491_v12, %v939_v13 }
 0x10c   : > { %v2616_v17 = vpop.f32.mrf.mxu0 }
 0x10d   : > { %v964_v18 = vadd.f32 %v959_v14, %v940_v16 }
 0x10e   : > { %v942_v19 = vpop.f32.mrf.mxu0 }
 0x10f   : > { %967 = vst.msk [vmem:[#allocation2 + $0x1] sm:$0xff] %vm966_vm4, %v964_v18  ;;  %v943_v21 = vadd.f32 %v2491_v12, %v942_v19 }
 0x110   : > { %v2617_v22 = vpop.f32.mrf.mxu0 }
 0x111   : > { %v965_v23 = vadd.f32 %v961_v20, %v943_v21 }
 0x113   : > { %968 = vst.msk [vmem:[#allocation2 + $0x9] sm:$0xff] %vm966_vm4, %v965_v23 }
 0x114 PF: > { %vm974_vm5 = vcmask 261120   ;;  %vm981_vm6 = vcmask 253952   ;;  %v2843_v45 = vld [vmem:[%s3238_s19 + $0x8] sm:$0xff]   ;;  %v2844_v46 = vld [vmem:[%s3238_s19] sm:$0xff]   ;;  %s3666_s20 = sld [smem:[#allocation23_spill]]  ;;  %s3668_s30 = scalar_lea.vmem %s3597_s6, %s3221_s2  ;;  %vm1121_vm7 = vcmask 64512  }
 0x115   : > { %2618 = vmatprep.subr.bf16.mxu0 %v2843_v45  ;;  %v2498_v0 = vld [vmem:[%s3668_s30] ss:$0 sm:$0xff]  ;;  %s3669_s23 = scalar_lea.vmem %s3599_s8, %s3221_s2  ;;  %s3019_s1 = smov 96   ;;  %vm1185_vm8 = vcmask 138240   ;;  %vm1192_vm9 = vcmask 131072   ;;  %vm1233_vm10 = vcmask 1040384  }
 0x116   : > { %v3309_v24 = vld [vmem:[#allocation2] sm:$0xff]  ;;  %2619 = vmatpush3.bf16.msra.mxu0 %v2843_v45  ;;  %s3020_s19 = smov 64   ;;  %s3021_s7 = smov 120   ;;  %vm1830_vm11 = vcmask 130048   ;;  %vm1834_vm12 = vcmask 195584   ;;  %vm2122_vm13 = vcmask 523264  }
 0x117   : > { %v975_v27 = vsel %vm974_vm5, %v3309_v24, 0.0  ;;  %2620 = vmatprep.subr.bf16.mxu0 %v2844_v46  ;;  %v2499_v8 = vld [vmem:[%s3669_s23] ss:$0 sm:$0xff]  ;;  %s3025_s29 = smov 80   ;;  %s3026_s26 = smov 112  }
 0x118   : > { %976 = vadd.xlane.f32.xlu0 %v975_v27  ;;  %s3027_s30 = smov 48   ;;  %s3028_s9 = smov 72  }
 0x119   : > { %s3029_s5 = smov 104   ;;  %s3030_s23 = smov 40  }
 0x11a   : > { %v3311_v25 = vld [vmem:[#allocation2 + $0x10] sm:$0x1]  ;;  %v3313_v26 = vld [vmem:[#allocation2 + $0x8] sm:$0xff]  ;;  %2621 = vmatpush3.bf16.msra.mxu0 %v2844_v46  ;;  %s3667_s27 = scalar_lea.vmem %s3666_s20, %s3221_s2  ;;  %s3022_s20 = smov 88  }
 0x11b   : > { %v982_v28 = vsel %vm981_vm6, %v3311_v25, 0.0  ;;  %v978_v29 = vsel %vm974_vm5, %v3313_v26, 0.0  ;;  %v2497_v58 = vld [vmem:[%s3667_s27] ss:$0 sm:$0xff]  ;;  %s3024_s27 = smov 56  }
 0x11c   : > { %983 = vadd.xlane.f32.xlu1 %v982_v28  ;;  %979 = vadd.xlane.f32.xlu0 %v978_v29 }
 0x1a1   : > { %v977_v30 = vpop.xlane.xlu0 %976 }
 0x1a2   : > { %v986_v32 = vmul.f32 0.03125, %v977_v30 }
 0x1a4   : > { %v989_v34 = vsub.f32 %v3309_v24, %v986_v32 }
 0x1a5   : > { %v984_v31 = vpop.xlane.xlu1 %983  ;;  %v980_v36 = vpop.xlane.xlu0 %979 }
 0x1a6   : > { %v988_v33 = vmul.f32 0.03125, %v984_v31  ;;  %v987_v37 = vmul.f32 0.03125, %v980_v36  ;;  %v992_v38 = vmul.f32 %v989_v34, %v989_v34 }
 0x1a8   : > { %v991_v35 = vsub.f32 %v3311_v25, %v988_v33  ;;  %v990_v40 = vsub.f32 %v3313_v26, %v987_v37  ;;  %v995_v41 = vsel %vm974_vm5, %v992_v38, 0.0 }
 0x1a9   : > { %996 = vadd.xlane.f32.xlu1 %v995_v41 }
 0x1aa   : > { %v994_v39 = vmul.f32 %v991_v35, %v991_v35  ;;  %v993_v43 = vmul.f32 %v990_v40, %v990_v40 }
 0x1ac   : > { %v1001_v42 = vsel %vm981_vm6, %v994_v39, 0.0  ;;  %v998_v44 = vsel %vm974_vm5, %v993_v43, 0.0 }
 0x1ad   : > { %1002 = vadd.xlane.f32.xlu1 %v1001_v42  ;;  %999 = vadd.xlane.f32.xlu0 %v998_v44 }
 0x232   : > { %v997_v47 = vpop.xlane.xlu1 %996 }
 0x233   : > { %v1004_v48 = vmul.f32 0.03125, %v997_v47 }
 0x235   : > { %v1007_v49 = vadd.f32 1e-05, %v1004_v48 }
 0x236   : > { %v1003_v50 = vpop.xlane.xlu1 %1002  ;;  %v1000_v51 = vpop.xlane.xlu0 %999 }
 0x237   : > { %2853 = vrsqrt.f32 %v1007_v49  ;;  %v1006_v52 = vmul.f32 0.03125, %v1003_v50  ;;  %v1005_v53 = vmul.f32 0.03125, %v1000_v51  ;;  %v3023_v51 = vmov 0  }
 0x239   : > { %v1009_v54 = vadd.f32 1e-05, %v1006_v52  ;;  %v1008_v55 = vadd.f32 1e-05, %v1005_v53  ;;  %v3372_v52 = vsel %vm1233_vm10, 65535, %v3023_v51 }
 0x23b   : > { %2855 = vrsqrt.f32 %v1009_v54 }
 0x23c   : > { %2857 = vrsqrt.f32 %v1008_v55 }
 0x244   : > { %v2854_v56 = vpop.eup %2853 }
 0x245   : > { %v1013_v57 = vmul.f32 %v2854_v56, %v989_v34 }
 0x247   : > { %v1022_v63 = vmul.f32 %v2497_v58, %v1013_v57 }
 0x248   : > { %v2856_v59 = vpop.eup %2855 }
 0x249   : > { %v2858_v60 = vpop.eup %2857  ;;  %v1015_v61 = vmul.f32 %v2856_v59, %v991_v35  ;;  %v1031_v4 = vadd.f32 %v2498_v0, %v1022_v63 }
 0x24a   : > { %v1014_v62 = vmul.f32 %v2858_v60, %v990_v40 }
 0x24b   : > { %v1024_v1 = vmul.f32 %v2497_v58, %v1015_v61 }
 0x24c   : > { %v1023_v2 = vmul.f32 %v2497_v58, %v1014_v62 }
 0x24d   : > { %v1033_v3 = vadd.f32 %v2498_v0, %v1024_v1 }
 0x24e   : > { %v1032_v5 = vadd.f32 %v2498_v0, %v1023_v2 }
 0x24f   : > { %v1035_v6 = vpack.c.bf16 %v1033_v3, %v1033_v3 }
 0x250   : > { %v1034_v7 = vpack.c.bf16 %v1032_v5, %v1031_v4 }
 0x252   : > { %2622 = vmatprep.mubr.msk.bf16.mxu0 %vm974_vm5, %v1034_v7 }
 0x253   : > { %2623 = vmatmul.mubr.msk.bf16.vlgmr.msra.gmra.mxu0 %vm974_vm5, %v1035_v6 }
 0x313   : > { %v2624_v9 = vpop.f32.mrf.mxu0 }
 0x314   : > { %v1108_v10 = vadd.f32 %v2624_v9, %v2499_v8 }
 0x315   : > { %v1099_v11 = vpop.f32.mrf.mxu0 }
 0x316   : > { %v3346_v12 = vpack.c.bf16 %v1108_v10, %v1108_v10  ;;  %v1100_v15 = vadd.f32 %v2499_v8, %v1099_v11 }
 0x317   : > { %v2625_v13 = vpop.f32.mrf.mxu0 }
 0x318   : > { %1119 = vrot.lane.b32.xlu0 %v3346_v12, %s3019_s1 }
 0x319   : > { %v1102_v14 = vpop.f32.mrf.mxu0 }
 0x31a   : > { %v1103_v16 = vadd.f32 %v2499_v8, %v1102_v14 }
 0x31c   : > { %v3349_v17 = vpack.c.bf16 %v1103_v16, %v1100_v15 }
 0x31e   : > { %1117 = vrot.lane.b32.xlu1 %v3349_v17, %s3019_s1  ;;  %2630 = vmatprep.mubr.msk.bf16.mxu1 %vm1121_vm7, %v3349_v17  ;;  %s3031_s1 = smov 8  }
 0x38a   : > { %v1120_v18 = vpop.permute.xlu0 %1119 }
 0x38b   : > { %2726 = vmatprep.subr.msk.bf16.mxu1 %vm1121_vm7, %v1120_v18  ;;  %v1132_v19 = vsel %vm1121_vm7, %v1120_v18, 0 }
 0x38c   : > { %2627 = vmatpush3.bf16.xpose.msra.mxu1 %v1132_v19 }
 0x390   : > { %v1118_v20 = vpop.permute.xlu1 %1117 }
 0x391   : > { %2727 = vmatprep.subr.msk.bf16.mxu1 %vm1121_vm7, %v1118_v20  ;;  %v1129_v21 = vsel %vm1121_vm7, %v1118_v20, 0 }
 0x394   : > { %2629 = vmatpush3.bf16.xpose.msra.mxu1 %v1129_v21 }
 0x39b   : > { %2631 = vmatmul.mubr.msk.bf16.vlgmr.msra.gmra.mxu1 %vm1121_vm7, %v3346_v12 }
 0x45b   : > { %v2632_v22 = vpop.f32.mrf.mxu1 }
 0x45c   : > { %v1184_v32 = vmul.f32 0.35355338, %v2632_v22 }
 0x45d   : > { %v1168_v23 = vpop.f32.mrf.mxu1 }
 0x45e   : > { %v1182_v27 = vmul.f32 0.35355338, %v1168_v23  ;;  %v1193_v34 = vsel %vm1192_vm9, %v1184_v32, -inf }
 0x45f   : > { %v2633_v28 = vpop.f32.mrf.mxu1 }
 0x460   : > { %v1186_v29 = vsel %vm1185_vm8, %v1182_v27, -inf }
 0x461   : > { %1187 = vmax.xlane.f32.xlu1 %v1186_v29  ;;  %v1171_v30 = vpop.f32.mrf.mxu1 }
 0x462   : > { %v1183_v31 = vmul.f32 0.35355338, %v1171_v30 }
 0x464   : > { %v1189_v33 = vsel %vm1185_vm8, %v1183_v31, -inf }
 0x465   : > { %1190 = vmax.xlane.f32.xlu0 %v1189_v33 }
 0x469   : > { %1194 = vmax.xlane.f32.xlu0 %v1193_v34 }
 0x4ea   : > { %v1188_v35 = vpop.xlane.xlu1 %1187 }
 0x4eb   : > { %v1196_v38 = vsub.f32 %v1182_v27, %v1188_v35 }
 0x4ed   : > { %v1199_v42 = vmul.f32 1.442695, %v1196_v38 }
 0x4ee   : > { %v1191_v36 = vpop.xlane.xlu0 %1190 }
 0x4ef   : > { %v1197_v37 = vsub.f32 %v1183_v31, %v1191_v36 }
 0x4f1   : > { %v1201_v39 = vmul.f32 1.442695, %v1197_v37 }
 0x4f2   : > { %v1195_v40 = vpop.xlane.xlu0 %1194 }
 0x4f3   : > { %2859 = vpow2.f32 %v1201_v39  ;;  %v1198_v41 = vsub.f32 %v1184_v32, %v1195_v40 }
 0x4f5   : > { %v1203_v43 = vmul.f32 1.442695, %v1198_v41 }
 0x4f7   : > { %2861 = vpow2.f32 %v1203_v43 }
 0x4f8   : > { %2863 = vpow2.f32 %v1199_v42 }
 0x500   : > { %v2860_v44 = vpop.eup %2859 }
 0x501   : > { %v1208_v45 = vsel %vm1185_vm8, %v2860_v44, 0.0 }
 0x502   : > { %1209 = vadd.xlane.f32.xlu0 %v1208_v45 }
 0x504   : > { %v2862_v46 = vpop.eup %2861 }
 0x505   : > { %v1211_v47 = vsel %vm1192_vm9, %v2862_v46, 0.0  ;;  %v2864_v48 = vpop.eup %2863 }
 0x506   : > { %1212 = vadd.xlane.f32.xlu1 %v1211_v47  ;;  %v1205_v49 = vsel %vm1185_vm8, %v2864_v48, 0.0 }
 0x50a   : > { %1206 = vadd.xlane.f32.xlu1 %v1205_v49 }
 0x518   : > { %1224 = vrot.lane.b32.xlu0 %v3346_v12, %s3020_s19 }
 0x51b   : > { %1222 = vrot.lane.b32.xlu1 %v3349_v17, %s3020_s19  ;;  %s3032_s19 = smov 16  }
 0x51c   : > { %1287 = vrot.lane.b32.xlu0 %v3349_v17, %s3021_s7 }
 0x51f   : > { %1293 = vrot.lane.b32.xlu1 %v3346_v12, %s3022_s20 }
 0x523   : > { %1291 = vrot.lane.b32.xlu1 %v3349_v17, %s3022_s20 }
 0x527   : > { %1289 = vrot.lane.b32.xlu1 %v3346_v12, %s3021_s7  ;;  %s3033_s7 = smov 24  }
 0x58b   : > { %v1210_v50 = vpop.xlane.xlu0 %1209 }
 0x58f   : > { %v1213_v53 = vpop.xlane.xlu1 %1212  ;;  %v1225_v54 = vpop.permute.xlu0 %1224 }
 0x590   : > { %v1237_v55 = vand.u32 %v3372_v52, %v1225_v54  ;;  %2865 = vrcp.f32 %v1213_v53 }
 0x591   : > { %2867 = vrcp.f32 %v1210_v50 }
 0x592   : > { %2634 = vmatprep.subr.bf16.mxu0 %v1237_v55 }
 0x593   : > { %v1207_v56 = vpop.xlane.xlu1 %1206  ;;  %2635 = vmatpush3.bf16.msra.mxu0 %v1237_v55  ;;  %v1288_v3 = vpop.permute.xlu0 %1287 }
 0x594   : > { %2869 = vrcp.f32 %v1207_v56 }
 0x597   : > { %v1223_v57 = vpop.permute.xlu1 %1222 }
 0x598   : > { %2636 = vmatprep.subr.bf16.mxu0 %v1223_v57 }
 0x599   : > { %2637 = vmatpush3.bf16.msra.mxu0 %v1223_v57 }
 0x59b   : > { %v1294_v58 = vpop.permute.xlu1 %1293 }
 0x59c   : > { %2728 = vmatprep.subr.msk.bf16.mxu0 %vm1121_vm7, %v1294_v58  ;;  %v1305_v4 = vsel %vm1121_vm7, %v1294_v58, 0 }
 0x59d   : > { %v2866_v59 = vpop.eup %2865 }
 0x59e   : > { %v2868_v60 = vpop.eup %2867  ;;  %v1219_v62 = vmul.f32 %v2866_v59, %v2862_v46 }
 0x59f   : > { %v1218_v0 = vmul.f32 %v2868_v60, %v2860_v44  ;;  %v1292_v5 = vpop.permute.xlu1 %1291 }
 0x5a0   : > { %v1221_v2 = vpack.c.bf16 %v1219_v62, %v1219_v62  ;;  %v1302_v6 = vsel %vm1121_vm7, %v1292_v5, 0 }
 0x5a1   : > { %v2870_v61 = vpop.eup %2869 }
 0x5a2   : > { %v1217_v63 = vmul.f32 %v2870_v61, %v2864_v48 }
 0x5a3   : > { %v1290_v7 = vpop.permute.xlu1 %1289 }
 0x5a4   : > { %v1220_v1 = vpack.c.bf16 %v1218_v0, %v1217_v63 }
 0x5a6   : > { %2638 = vmatprep.mubr.msk.bf16.mxu0 %vm1185_vm8, %v1220_v1 }
 0x5a7   : > { %2639 = vmatmul.mubr.msk.bf16.vlgmr.msra.gmra.mxu0 %vm1185_vm8, %v1221_v2 }
 0x5a8   : > { %2643 = vmatpush3.bf16.xpose.msra.mxu0 %v1305_v4  ;;  %2646 = vmatprep.mubr.msk.bf16.mxu0 %vm1121_vm7, %v1288_v3 }
 0x5a9   : > { %2729 = vmatprep.subr.msk.bf16.mxu0 %vm1121_vm7, %v1292_v5 }
 0x5b0   : > { %2645 = vmatpush3.bf16.xpose.msra.mxu0 %v1302_v6 }
 0x5b7   : > { %2647 = vmatmul.mubr.msk.bf16.vlgmr.msra.gmra.mxu0 %vm1121_vm7, %v1290_v7 }
 0x667   : > { %v3383_v8 = vpop.f32.mrf.mxu0 }
 0x669   : > { %v3385_v9 = vpop.f32.mrf.mxu0 }
 0x66b   : > { %v2641_v10 = vpop.f32.mrf.mxu0 }
 0x66d   : > { %v3387_v11 = vpop.f32.mrf.mxu0 }
 0x677   : > { %v2648_v13 = vpop.f32.mrf.mxu0 }
 0x678   : > { %v1357_v18 = vmul.f32 0.35355338, %v2648_v13 }
 0x679   : > { %v1341_v14 = vpop.f32.mrf.mxu0 }
 0x67a   : > { %v1355_v15 = vmul.f32 0.35355338, %v1341_v14  ;;  %v1364_v22 = vsel %vm1192_vm9, %v1357_v18, -inf }
 0x67b   : > { %v2649_v16 = vpop.f32.mrf.mxu0 }
 0x67c   : > { %v1358_v19 = vsel %vm1185_vm8, %v1355_v15, -inf }
 0x67d   : > { %1359 = vmax.xlane.f32.xlu0 %v1358_v19  ;;  %v1344_v20 = vpop.f32.mrf.mxu0 }
 0x67e   : > { %v1356_v21 = vmul.f32 0.35355338, %v1344_v20 }
 0x680   : > { %v1361_v23 = vsel %vm1185_vm8, %v1356_v21, -inf }
 0x681   : > { %1365 = vmax.xlane.f32.xlu0 %v1364_v22  ;;  %1362 = vmax.xlane.f32.xlu1 %v1361_v23 }
 0x706   : > { %v1360_v27 = vpop.xlane.xlu0 %1359 }
 0x707   : > { %v1367_v28 = vsub.f32 %v1355_v15, %v1360_v27 }
 0x709   : > { %v1370_v29 = vmul.f32 1.442695, %v1367_v28 }
 0x70a   : > { %v1366_v30 = vpop.xlane.xlu0 %1365  ;;  %v1363_v31 = vpop.xlane.xlu1 %1362 }
 0x70b   : > { %2871 = vpow2.f32 %v1370_v29  ;;  %v1369_v32 = vsub.f32 %v1357_v18, %v1366_v30  ;;  %v1368_v33 = vsub.f32 %v1356_v21, %v1363_v31 }
 0x70d   : > { %v1374_v34 = vmul.f32 1.442695, %v1369_v32  ;;  %v1372_v35 = vmul.f32 1.442695, %v1368_v33 }
 0x70f   : > { %2873 = vpow2.f32 %v1374_v34 }
 0x710   : > { %2875 = vpow2.f32 %v1372_v35 }
 0x718   : > { %v2872_v36 = vpop.eup %2871 }
 0x719   : > { %v1376_v37 = vsel %vm1185_vm8, %v2872_v36, 0.0 }
 0x71a   : > { %1377 = vadd.xlane.f32.xlu0 %v1376_v37 }
 0x71c   : > { %v2874_v38 = vpop.eup %2873 }
 0x71d   : > { %v2876_v39 = vpop.eup %2875  ;;  %v1382_v40 = vsel %vm1192_vm9, %v2874_v38, 0.0 }
 0x71e   : > { %1383 = vadd.xlane.f32.xlu1 %v1382_v40  ;;  %v1379_v41 = vsel %vm1185_vm8, %v2876_v39, 0.0 }
 0x71f   : > { %1380 = vadd.xlane.f32.xlu0 %v1379_v41 }
 0x72f   : > { %1393 = vrot.lane.b32.xlu1 %v3349_v17, %s3024_s27 }
 0x733   : > { %1461 = vrot.lane.b32.xlu1 %v3346_v12, %s3025_s29 }
 0x735   : > { %1395 = vrot.lane.b32.xlu0 %v3346_v12, %s3024_s27  ;;  %s3670_s27 = scalar_lea.vmem %s3601_s10, %s3221_s2 }
 0x737   : > { %1459 = vrot.lane.b32.xlu1 %v3349_v17, %s3025_s29 }
 0x739   : > { %1455 = vrot.lane.b32.xlu0 %v3349_v17, %s3026_s26 }
 0x73b   : > { %1457 = vrot.lane.b32.xlu1 %v3346_v12, %s3026_s26  ;;  %s3671_s26 = scalar_lea.vmem %s3602_s11, %s3221_s2  ;;  %s3672_s2 = sld [smem:[#allocation8_spill]] }
 0x741   : > { %p2539_p1 = scmp.ne.s32.totalorder %s3672_s2, 1 }
 0x7a3   : > { %v1378_v42 = vpop.xlane.xlu0 %1377 }
 0x7a4   : > { %2877 = vrcp.f32 %v1378_v42 }
 0x7a7   : > { %v1384_v43 = vpop.xlane.xlu1 %1383 }
 0x7a8   : > { %v1381_v44 = vpop.xlane.xlu0 %1380  ;;  %2879 = vrcp.f32 %v1384_v43 }
 0x7a9   : > { %2881 = vrcp.f32 %v1381_v44 }
 0x7ab   : > { %v1394_v47 = vpop.permute.xlu1 %1393 }
 0x7ac   : > { %v1396_v45 = vpop.permute.xlu0 %1395 }
 0x7ad   : > { %v1405_v46 = vand.u32 %v1396_v45, %v3372_v52 }
 0x7af   : > { %2650 = vmatprep.subr.bf16.mxu1 %v1405_v46  ;;  %v1462_v49 = vpop.permute.xlu1 %1461 }
 0x7b0   : > { %2651 = vmatpush3.bf16.msra.mxu1 %v1405_v46  ;;  %v1456_v58 = vpop.permute.xlu0 %1455  ;;  %v1473_v59 = vsel %vm1121_vm7, %v1462_v49, 0 }
 0x7b1   : > { %2652 = vmatprep.subr.bf16.mxu1 %v1394_v47  ;;  %v2878_v48 = vpop.eup %2877 }
 0x7b2   : > { %v1388_v54 = vmul.f32 %v2878_v48, %v2872_v36 }
 0x7b3   : > { %v1460_v60 = vpop.permute.xlu1 %1459 }
 0x7b4   : > { %2653 = vmatpush3.bf16.msra.mxu1 %v1394_v47  ;;  %v1470_v61 = vsel %vm1121_vm7, %v1460_v60, 0 }
 0x7b5   : > { %v2880_v50 = vpop.eup %2879  ;;  %2730 = vmatprep.subr.msk.bf16.mxu1 %vm1121_vm7, %v1462_v49 }
 0x7b6   : > { %v2882_v51 = vpop.eup %2881  ;;  %v1390_v53 = vmul.f32 %v2880_v50, %v2874_v38 }
 0x7b7   : > { %v1389_v55 = vmul.f32 %v2882_v51, %v2876_v39  ;;  %v1458_v62 = vpop.permute.xlu1 %1457 }
 0x7b8   : > { %v1392_v56 = vpack.c.bf16 %v1390_v53, %v1390_v53 }
 0x7b9   : > { %v1391_v57 = vpack.c.bf16 %v1389_v55, %v1388_v54 }
 0x7bb   : > { %2654 = vmatprep.mubr.msk.bf16.mxu1 %vm1185_vm8, %v1391_v57 }
 0x7bc   : > { %2655 = vmatmul.mubr.msk.bf16.vlgmr.msra.gmra.mxu1 %vm1185_vm8, %v1392_v56 }
 0x7bd   : > { %2659 = vmatpush3.bf16.xpose.msra.mxu1 %v1473_v59  ;;  %2662 = vmatprep.mubr.msk.bf16.mxu1 %vm1121_vm7, %v1456_v58 }
 0x7be   : > { %2731 = vmatprep.subr.msk.bf16.mxu1 %vm1121_vm7, %v1460_v60 }
 0x7c5   : > { %2661 = vmatpush3.bf16.xpose.msra.mxu1 %v1470_v61 }
 0x7cc   : > { %2663 = vmatmul.mubr.msk.bf16.vlgmr.msra.gmra.mxu1 %vm1121_vm7, %v1458_v62 }
 0x87c   : > { %v3410_v63 = vpop.f32.mrf.mxu1 }
 0x87e   : > { %v3412_v0 = vpop.f32.mrf.mxu1 }
 0x880   : > { %v2657_v1 = vpop.f32.mrf.mxu1 }
 0x882   : > { %v3414_v2 = vpop.f32.mrf.mxu1 }
 0x883   : > { %v2828_v3 = vpack.i.bf16 %v3414_v2, %v3412_v0 }
 0x88c   : > { %v2664_v4 = vpop.f32.mrf.mxu1 }
 0x88d   : > { %v1525_v10 = vmul.f32 0.35355338, %v2664_v4 }
 0x88e   : > { %v1509_v5 = vpop.f32.mrf.mxu1 }
 0x88f   : > { %v1523_v6 = vmul.f32 0.35355338, %v1509_v5  ;;  %v1532_v16 = vsel %vm1192_vm9, %v1525_v10, -inf }
 0x890   : > { %v2665_v7 = vpop.f32.mrf.mxu1 }
 0x891   : > { %v1526_v13 = vsel %vm1185_vm8, %v1523_v6, -inf }
 0x892   : > { %1527 = vmax.xlane.f32.xlu0 %v1526_v13  ;;  %v1512_v14 = vpop.f32.mrf.mxu1 }
 0x893   : > { %v1524_v15 = vmul.f32 0.35355338, %v1512_v14 }
 0x895   : > { %v1529_v18 = vsel %vm1185_vm8, %v1524_v15, -inf }
 0x896   : > { %1533 = vmax.xlane.f32.xlu0 %v1532_v16  ;;  %1530 = vmax.xlane.f32.xlu1 %v1529_v18 }
 0x91b   : > { %v1528_v19 = vpop.xlane.xlu0 %1527 }
 0x91c   : > { %v1535_v20 = vsub.f32 %v1523_v6, %v1528_v19 }
 0x91e   : > { %v1538_v21 = vmul.f32 1.442695, %v1535_v20 }
 0x91f   : > { %v1534_v22 = vpop.xlane.xlu0 %1533  ;;  %v1531_v23 = vpop.xlane.xlu1 %1530 }
 0x920   : > { %2883 = vpow2.f32 %v1538_v21  ;;  %v1537_v27 = vsub.f32 %v1525_v10, %v1534_v22  ;;  %v1536_v28 = vsub.f32 %v1524_v15, %v1531_v23 }
 0x922   : > { %v1542_v29 = vmul.f32 1.442695, %v1537_v27  ;;  %v1540_v30 = vmul.f32 1.442695, %v1536_v28 }
 0x924   : > { %2885 = vpow2.f32 %v1542_v29 }
 0x925   : > { %2887 = vpow2.f32 %v1540_v30 }
 0x92d   : > { %v2884_v31 = vpop.eup %2883 }
 0x92e   : > { %v1544_v32 = vsel %vm1185_vm8, %v2884_v31, 0.0 }
 0x92f   : > { %1545 = vadd.xlane.f32.xlu0 %v1544_v32 }
 0x931   : > { %v2886_v33 = vpop.eup %2885 }
 0x932   : > { %v2888_v34 = vpop.eup %2887  ;;  %v1550_v35 = vsel %vm1192_vm9, %v2886_v33, 0.0 }
 0x933   : > { %1551 = vadd.xlane.f32.xlu1 %v1550_v35  ;;  %v1547_v36 = vsel %vm1185_vm8, %v2888_v34, 0.0 }
 0x934   : > { %1548 = vadd.xlane.f32.xlu0 %v1547_v36 }
 0x944   : > { %1561 = vrot.lane.b32.xlu1 %v3349_v17, %s3027_s30 }
 0x948   : > { %1629 = vrot.lane.b32.xlu1 %v3346_v12, %s3028_s9 }
 0x94a   : > { %1563 = vrot.lane.b32.xlu0 %v3346_v12, %s3027_s30 }
 0x94c   : > { %1627 = vrot.lane.b32.xlu1 %v3349_v17, %s3028_s9 }
 0x94e   : > { %1623 = vrot.lane.b32.xlu0 %v3349_v17, %s3029_s5 }
 0x950   : > { %1625 = vrot.lane.b32.xlu1 %v3346_v12, %s3029_s5 }
 0x9b8   : > { %v1546_v37 = vpop.xlane.xlu0 %1545 }
 0x9b9   : > { %2889 = vrcp.f32 %v1546_v37 }
 0x9bc   : > { %v1552_v38 = vpop.xlane.xlu1 %1551 }
 0x9bd   : > { %v1549_v39 = vpop.xlane.xlu0 %1548  ;;  %2891 = vrcp.f32 %v1552_v38 }
 0x9be   : > { %2893 = vrcp.f32 %v1549_v39 }
 0x9c0   : > { %v1562_v42 = vpop.permute.xlu1 %1561 }
 0x9c1   : > { %v1564_v40 = vpop.permute.xlu0 %1563 }
 0x9c2   : > { %v1573_v41 = vand.u32 %v1564_v40, %v3372_v52 }
 0x9c4   : > { %2666 = vmatprep.subr.bf16.mxu0 %v1573_v41  ;;  %v1630_v44 = vpop.permute.xlu1 %1629 }
 0x9c5   : > { %2667 = vmatpush3.bf16.msra.mxu0 %v1573_v41  ;;  %v1624_v53 = vpop.permute.xlu0 %1623  ;;  %v1641_v54 = vsel %vm1121_vm7, %v1630_v44, 0 }
 0x9c6   : > { %2668 = vmatprep.subr.bf16.mxu0 %v1562_v42  ;;  %v2890_v43 = vpop.eup %2889 }
 0x9c7   : > { %v1556_v48 = vmul.f32 %v2890_v43, %v2884_v31 }
 0x9c8   : > { %v1628_v55 = vpop.permute.xlu1 %1627 }
 0x9c9   : > { %2669 = vmatpush3.bf16.msra.mxu0 %v1562_v42  ;;  %v1638_v56 = vsel %vm1121_vm7, %v1628_v55, 0 }
 0x9ca   : > { %v2892_v45 = vpop.eup %2891  ;;  %2732 = vmatprep.subr.msk.bf16.mxu0 %vm1121_vm7, %v1630_v44  ;;  %v2846_v44 = vld [vmem:[%s3247_s24] sm:$0xff]  }
 0x9cb   : > { %v2894_v46 = vpop.eup %2893  ;;  %v1558_v47 = vmul.f32 %v2892_v45, %v2886_v33 }
 0x9cc   : > { %v1557_v49 = vmul.f32 %v2894_v46, %v2888_v34  ;;  %v1626_v57 = vpop.permute.xlu1 %1625 }
 0x9cd   : > { %v1560_v50 = vpack.c.bf16 %v1558_v47, %v1558_v47 }
 0x9ce   : > { %v1559_v51 = vpack.c.bf16 %v1557_v49, %v1556_v48 }
 0x9d0   : > { %2670 = vmatprep.mubr.msk.bf16.mxu0 %vm1185_vm8, %v1559_v51 }
 0x9d1   : > { %2671 = vmatmul.mubr.msk.bf16.vlgmr.msra.gmra.mxu0 %vm1185_vm8, %v1560_v50 }
 0x9d2   : > { %2675 = vmatpush3.bf16.xpose.msra.mxu0 %v1641_v54  ;;  %2678 = vmatprep.mubr.msk.bf16.mxu0 %vm1121_vm7, %v1624_v53 }
 0x9d3   : > { %2733 = vmatprep.subr.msk.bf16.mxu0 %vm1121_vm7, %v1628_v55 }
 0x9da   : > { %2677 = vmatpush3.bf16.xpose.msra.mxu0 %v1638_v56 }
 0x9e1   : > { %2679 = vmatmul.mubr.msk.bf16.vlgmr.msra.gmra.mxu0 %vm1121_vm7, %v1626_v57 }
 0xa91   : > { %v2672_v58 = vpop.f32.mrf.mxu0 }
 0xa93   : > { %v1609_v59 = vpop.f32.mrf.mxu0 }
 0xa95   : > { %v2673_v60 = vpop.f32.mrf.mxu0 }
 0xa97   : > { %v1612_v61 = vpop.f32.mrf.mxu0 }
 0xa98   : > { %v2833_v62 = vpack.i.bf16 %v1612_v61, %v1609_v59 }
 0xaa1   : > { %v2680_v1 = vpop.f32.mrf.mxu0 }
 0xaa2   : > { %v1693_v7 = vmul.f32 0.35355338, %v2680_v1 }
 0xaa3   : > { %v1677_v4 = vpop.f32.mrf.mxu0 }
 0xaa4   : > { %v1691_v5 = vmul.f32 0.35355338, %v1677_v4  ;;  %v1700_v15 = vsel %vm1192_vm9, %v1693_v7, -inf }
 0xaa5   : > { %v2681_v6 = vpop.f32.mrf.mxu0 }
 0xaa6   : > { %v1694_v10 = vsel %vm1185_vm8, %v1691_v5, -inf }
 0xaa7   : > { %1695 = vmax.xlane.f32.xlu0 %v1694_v10  ;;  %v1680_v13 = vpop.f32.mrf.mxu0 }
 0xaa8   : > { %v1692_v14 = vmul.f32 0.35355338, %v1680_v13 }
 0xaaa   : > { %v1697_v16 = vsel %vm1185_vm8, %v1692_v14, -inf }
 0xaab   : > { %1701 = vmax.xlane.f32.xlu0 %v1700_v15  ;;  %1698 = vmax.xlane.f32.xlu1 %v1697_v16 }
 0xb30   : > { %v1696_v18 = vpop.xlane.xlu0 %1695 }
 0xb31   : > { %v1703_v19 = vsub.f32 %v1691_v5, %v1696_v18 }
 0xb33   : > { %v1706_v20 = vmul.f32 1.442695, %v1703_v19 }
 0xb34   : > { %v1702_v21 = vpop.xlane.xlu0 %1701  ;;  %v1699_v22 = vpop.xlane.xlu1 %1698 }
 0xb35   : > { %2895 = vpow2.f32 %v1706_v20  ;;  %v1705_v23 = vsub.f32 %v1693_v7, %v1702_v21  ;;  %v1704_v27 = vsub.f32 %v1692_v14, %v1699_v22  ;;  %v2524_v20 = vld [vmem:[%s3670_s27] ss:$0 sm:$0xff]  ;;  %s3674_s27 = sld [smem:[#allocation26_spill]] (!%p2539_p1) }
 0xb37   : > { %v1710_v28 = vmul.f32 1.442695, %v1705_v23  ;;  %v1708_v29 = vmul.f32 1.442695, %v1704_v27 }
 0xb39   : > { %2897 = vpow2.f32 %v1710_v28 }
 0xb3a   : > { %2899 = vpow2.f32 %v1708_v29 }
 0xb42   : > { %v2896_v30 = vpop.eup %2895 }
 0xb43   : > { %v1712_v31 = vsel %vm1185_vm8, %v2896_v30, 0.0 }
 0xb44   : > { %1713 = vadd.xlane.f32.xlu0 %v1712_v31 }
 0xb46   : > { %v2898_v32 = vpop.eup %2897 }
 0xb47   : > { %v2900_v33 = vpop.eup %2899  ;;  %v1718_v34 = vsel %vm1192_vm9, %v2898_v32, 0.0 }
 0xb48   : > { %1719 = vadd.xlane.f32.xlu1 %v1718_v34  ;;  %v1715_v35 = vsel %vm1185_vm8, %v2900_v33, 0.0 }
 0xb49   : > { %1716 = vadd.xlane.f32.xlu0 %v1715_v35 }
 0xb59   : > { %1729 = vrot.lane.b32.xlu1 %v3349_v17, %s3030_s23 }
 0xb5d   : > { %2829 = vrot.lane.b32.xlu1 %v2828_v3, %s3031_s1 }
 0xb5f   : > { %1731 = vrot.lane.b32.xlu0 %v3346_v12, %s3030_s23 }
 0xb61   : > { %1798 = vrot.lane.b32.xlu1 %v3410_v63, %s3031_s1  ;;  %s3673_s1 = sld [smem:[#allocation28_spill]] (!%p2539_p1) }
 0xb63   : > { %2834 = vrot.lane.b32.xlu0 %v2833_v62, %s3032_s19 }
 0xb65   : > { %1810 = vrot.lane.b32.xlu1 %v2672_v58, %s3032_s19 }
 0xbcd   : > { %v1714_v36 = vpop.xlane.xlu0 %1713 }
 0xbce   : > { %2901 = vrcp.f32 %v1714_v36 }
 0xbd1   : > { %v1720_v37 = vpop.xlane.xlu1 %1719 }
 0xbd2   : > { %v1717_v38 = vpop.xlane.xlu0 %1716  ;;  %2903 = vrcp.f32 %v1720_v37 }
 0xbd3   : > { %2905 = vrcp.f32 %v1717_v38 }
 0xbd5   : > { %v1730_v0 = vpop.permute.xlu1 %1729 }
 0xbd6   : > { %v1732_v39 = vpop.permute.xlu0 %1731 }
 0xbd7   : > { %v1741_v17 = vand.u32 %v1732_v39, %v3372_v52  ;;  %v2845_v52 = vld [vmem:[%s3247_s24 + $0x8] sm:$0xff]  }
 0xbd9   : > { %2682 = vmatprep.subr.bf16.mxu1 %v1741_v17  ;;  %v2830_v50 = vpop.permute.xlu1 %2829 }
 0xbda   : > { %2683 = vmatpush3.bf16.msra.mxu1 %v1741_v17  ;;  %v2835_v53 = vpop.permute.xlu0 %2834  ;;  %v2832_v54 = vunpack.i.h.bf16 %v2830_v50  ;;  %v2831_v55 = vunpack.i.l.bf16 %v2830_v50 }
 0xbdb   : > { %2684 = vmatprep.subr.bf16.mxu1 %v1730_v0  ;;  %v2902_v12 = vpop.eup %2901  ;;  %v2837_v57 = vunpack.i.h.bf16 %v2835_v53  ;;  %v2836_v58 = vunpack.i.l.bf16 %v2835_v53 }
 0xbdc   : > { %v1724_v40 = vmul.f32 %v2902_v12, %v2896_v30  ;;  %v1828_v59 = vsel %vm1121_vm7, %v3387_v11, %v2832_v54  ;;  %v1827_v60 = vsel %vm1121_vm7, %v3385_v9, %v2831_v55 }
 0xbdd   : > { %v1799_v51 = vpop.permute.xlu1 %1798  ;;  %v1831_v7 = vsel %vm1830_vm11, %v1827_v60, %v2836_v58  ;;  %v1832_v10 = vsel %vm1830_vm11, %v1828_v59, %v2837_v57  ;;  %v2526_v58 = vld [vmem:[%s841_s0] ss:$0 sm:$0xff]  ;;  %s3676_s0 = sld [smem:[#allocation29_spill]] (!%p2539_p1) }
 0xbde   : > { %2685 = vmatpush3.bf16.msra.mxu1 %v1730_v0  ;;  %v1829_v62 = vsel %vm1121_vm7, %v3383_v8, %v1799_v51  ;;  %v2525_v51 = vld [vmem:[%s3671_s26] ss:$0 sm:$0xff]  ;;  %s3675_s26 = sld [smem:[#allocation27_spill]] (!%p2539_p1) }
 0xbdf   : > { %v2904_v63 = vpop.eup %2903  ;;  %2690 = vmatprep.subr.bf16.mxu1 %v2845_v52 }
 0xbe0   : > { %v2906_v2 = vpop.eup %2905  ;;  %v1726_v3 = vmul.f32 %v2904_v63, %v2898_v32 }
 0xbe1   : > { %v1725_v41 = vmul.f32 %v2906_v2, %v2900_v33  ;;  %v1811_v56 = vpop.permute.xlu1 %1810 }
 0xbe2   : > { %v1728_v42 = vpack.c.bf16 %v1726_v3, %v1726_v3  ;;  %v1833_v4 = vsel %vm1830_vm11, %v1829_v62, %v1811_v56  ;;  %v2847_v3 = vld [vmem:[%s3264_s28 + $0x8] sm:$0xff]  }
 0xbe3   : > { %v1727_v43 = vpack.c.bf16 %v1725_v41, %v1724_v40  ;;  %v2848_v40 = vld [vmem:[%s3264_s28] sm:$0xff]   ;;  %2698 = vmatprep.subr.bf16.mxu0 %v2847_v3 }
 0xbe4   : > { %2699 = vmatpush3.bf16.msra.mxu0 %v2847_v3 }
 0xbe5   : > { %2686 = vmatprep.mubr.msk.bf16.mxu1 %vm1185_vm8, %v1727_v43  ;;  %2700 = vmatprep.subr.bf16.mxu0 %v2848_v40 }
 0xbe6   : > { %2687 = vmatmul.mubr.msk.bf16.vlgmr.msra.gmra.mxu1 %vm1185_vm8, %v1728_v42 }
 0xbe7   : > { %2691 = vmatpush3.bf16.msra.mxu1 %v2845_v52 }
 0xbe8   : > { %2692 = vmatprep.subr.bf16.mxu1 %v2846_v44  ;;  %2701 = vmatpush3.bf16.msra.mxu0 %v2848_v40 }
 0xbeb   : > { %2693 = vmatpush3.bf16.msra.mxu1 %v2846_v44 }
 0xca6   : > { %v2688_v45 = vpop.f32.mrf.mxu1 }
 0xca7   : > { %1822 = vrot.lane.b32.xlu1 %v2688_v45, %s3033_s7 }
 0xca8   : > { %v1777_v46 = vpop.f32.mrf.mxu1 }
 0xcaa   : > { %v2689_v47 = vpop.f32.mrf.mxu1 }
 0xcac   : > { %v1780_v48 = vpop.f32.mrf.mxu1 }
 0xcad   : > { %v2838_v49 = vpack.i.bf16 %v1780_v48, %v1777_v46 }
 0xcaf   : > { %2839 = vrot.lane.b32.xlu0 %v2838_v49, %s3033_s7 }
 0xd19   : > { %v1823_v61 = vpop.permute.xlu1 %1822 }
 0xd1a   : > { %v1837_v13 = vsel %vm1834_vm12, %v1833_v4, %v1823_v61 }
 0xd1b   : > { %v1839_v16 = vpack.c.bf16 %v1837_v13, %v1837_v13  ;;  %v2852_v13 = vld [vmem:[%s3278_s3] sm:$0xff]  }
 0xd21   : > { %v2840_v1 = vpop.permute.xlu0 %2839 }
 0xd22   : > { %v2842_v5 = vunpack.i.h.bf16 %v2840_v1  ;;  %v2841_v6 = vunpack.i.l.bf16 %v2840_v1 }
 0xd24   : > { %v1835_v14 = vsel %vm1834_vm12, %v1831_v7, %v2841_v6  ;;  %v1836_v15 = vsel %vm1834_vm12, %v1832_v10, %v2842_v5  ;;  %v2849_v6 = vld [vmem:[%s3278_s3 + $0x18] sm:$0xff]   ;;  %v2850_v7 = vld [vmem:[%s3278_s3 + $0x10] sm:$0xff]   ;;  %v2851_v10 = vld [vmem:[%s3278_s3 + $0x8] sm:$0xff]  }
 0xd25   : > { %v1838_v11 = vpack.c.bf16 %v1836_v15, %v1835_v14  ;;  %2706 = vmatprep.subr.bf16.mxu1 %v2849_v6  ;;  %v2527_v14 = vld [vmem:[%s849_s22] ss:$0 sm:$0xff] }
 0xd27   : > { %2694 = vmatprep.mubr.msk.bf16.mxu1 %vm974_vm5, %v1838_v11 }
 0xd28   : > { %2695 = vmatmul.mubr.msk.bf16.vlgmr.msra.gmra.mxu1 %vm974_vm5, %v1839_v16 }
 0xd29   : > { %2707 = vmatpush3.bf16.msra.mxu1 %v2849_v6 }
 0xd2a   : > { %2708 = vmatprep.subr.bf16.mxu1 %v2850_v7 }
 0xd2d   : > { %2709 = vmatpush3.bf16.msra.mxu1 %v2850_v7 }
 0xd2e   : > { %2710 = vmatprep.subr.bf16.mxu1 %v2851_v10 }
 0xd31   : > { %2711 = vmatpush3.bf16.msra.mxu1 %v2851_v10 }
 0xd32   : > { %2712 = vmatprep.subr.bf16.mxu1 %v2852_v13 }
 0xd35   : > { %2713 = vmatpush3.bf16.msra.mxu1 %v2852_v13 }
 0xde8   : > { %v2696_v9 = vpop.f32.mrf.mxu1 }
 0xde9   : > { %v1912_v8 = vadd.f32 %v2696_v9, %v3311_v25 }
 0xdea   : > { %v1896_v18 = vpop.f32.mrf.mxu1 }
 0xdeb   : > { %v1910_v19 = vadd.f32 %v1896_v18, %v3309_v24  ;;  %v3473_v27 = vadd.f32 %v2524_v20, %v1912_v8 }
 0xdec   : > { %v2697_v21 = vpop.f32.mrf.mxu1 }
 0xded   : > { %v3471_v22 = vadd.f32 %v2524_v20, %v1910_v19  ;;  %v1931_v24 = vsel %vm981_vm6, %v3473_v27, 0.0 }
 0xdee   : > { %v1899_v23 = vpop.f32.mrf.mxu1 }
 0xdef   : > { %v1911_v28 = vadd.f32 %v1899_v23, %v3313_v26  ;;  %v1925_v29 = vsel %vm974_vm5, %v3471_v22, 0.0 }
 0xdf0   : > { %1926 = vadd.xlane.f32.xlu0 %v1925_v29 }
 0xdf1   : > { %v3478_v25 = vadd.f32 %v2524_v20, %v1911_v28 }
 0xdf3   : > { %v1928_v30 = vsel %vm974_vm5, %v3478_v25, 0.0 }
 0xdf4   : > { %1932 = vadd.xlane.f32.xlu0 %v1931_v24  ;;  %1929 = vadd.xlane.f32.xlu1 %v1928_v30 }
 0xe79   : > { %v1927_v31 = vpop.xlane.xlu0 %1926 }
 0xe7a   : > { %v1934_v32 = vmul.f32 0.03125, %v1927_v31 }
 0xe7c   : > { %v1937_v33 = vsub.f32 %v3471_v22, %v1934_v32 }
 0xe7d   : > { %v1933_v26 = vpop.xlane.xlu0 %1932  ;;  %v1930_v34 = vpop.xlane.xlu1 %1929 }
 0xe7e   : > { %v1936_v35 = vmul.f32 0.03125, %v1933_v26  ;;  %v1935_v36 = vmul.f32 0.03125, %v1930_v34  ;;  %v1940_v37 = vmul.f32 %v1937_v33, %v1937_v33 }
 0xe80   : > { %v1939_v38 = vsub.f32 %v3473_v27, %v1936_v35  ;;  %v1938_v39 = vsub.f32 %v3478_v25, %v1935_v36  ;;  %v1943_v17 = vsel %vm974_vm5, %v1940_v37, 0.0 }
 0xe81   : > { %1944 = vadd.xlane.f32.xlu0 %v1943_v17 }
 0xe82   : > { %v1942_v0 = vmul.f32 %v1939_v38, %v1939_v38  ;;  %v1941_v12 = vmul.f32 %v1938_v39, %v1938_v39 }
 0xe84   : > { %v1949_v63 = vsel %vm981_vm6, %v1942_v0, 0.0  ;;  %v1946_v2 = vsel %vm974_vm5, %v1941_v12, 0.0 }
 0xe85   : > { %1950 = vadd.xlane.f32.xlu1 %v1949_v63  ;;  %1947 = vadd.xlane.f32.xlu0 %v1946_v2 }
 0xf0a   : > { %v1945_v41 = vpop.xlane.xlu0 %1944 }
 0xf0b   : > { %v1952_v42 = vmul.f32 0.03125, %v1945_v41 }
 0xf0d   : > { %v1955_v43 = vadd.f32 1e-05, %v1952_v42 }
 0xf0e   : > { %v1948_v52 = vpop.xlane.xlu0 %1947  ;;  %v1951_v44 = vpop.xlane.xlu1 %1950 }
 0xf0f   : > { %2907 = vrsqrt.f32 %v1955_v43  ;;  %v1953_v45 = vmul.f32 0.03125, %v1948_v52  ;;  %v1954_v46 = vmul.f32 0.03125, %v1951_v44 }
 0xf11   : > { %v1956_v47 = vadd.f32 1e-05, %v1953_v45  ;;  %v1957_v48 = vadd.f32 1e-05, %v1954_v46  ;;  %v2538_v46 = vld [vmem:[%s857_s21] ss:$0 sm:$0xff] }
 0xf13   : > { %2909 = vrsqrt.f32 %v1956_v47 }
 0xf14   : > { %2911 = vrsqrt.f32 %v1957_v48 }
 0xf1c   : > { %v2908_v49 = vpop.eup %2907 }
 0xf1d   : > { %v1961_v50 = vmul.f32 %v2908_v49, %v1937_v33 }
 0xf1f   : > { %v1970_v56 = vmul.f32 %v2525_v51, %v1961_v50 }
 0xf20   : > { %v2910_v53 = vpop.eup %2909 }
 0xf21   : > { %v2912_v54 = vpop.eup %2911  ;;  %v1962_v55 = vmul.f32 %v2910_v53, %v1938_v39  ;;  %v1979_v61 = vadd.f32 %v2526_v58, %v1970_v56 }
 0xf22   : > { %v1963_v57 = vmul.f32 %v2912_v54, %v1939_v38 }
 0xf23   : > { %v1971_v59 = vmul.f32 %v2525_v51, %v1962_v55 }
 0xf24   : > { %v1972_v60 = vmul.f32 %v2525_v51, %v1963_v57 }
 0xf25   : > { %v1980_v62 = vadd.f32 %v2526_v58, %v1971_v59 }
 0xf26   : > { %v1981_v1 = vadd.f32 %v2526_v58, %v1972_v60 }
 0xf27   : > { %v1982_v4 = vpack.c.bf16 %v1980_v62, %v1979_v61 }
 0xf28   : > { %v1983_v5 = vpack.c.bf16 %v1981_v1, %v1981_v1 }
 0xf29   : > { %2702 = vmatprep.mubr.msk.bf16.mxu0 %vm974_vm5, %v1982_v4 }
 0xf2a   : > { %2703 = vmatmul.mubr.msk.bf16.vlgmr.msra.gmra.mxu0 %vm974_vm5, %v1983_v5 }
 0xfea   : > { %v2704_v15 = vpop.f32.mrf.mxu0 }
 0xfeb   : > { %v2056_v11 = vadd.f32 %v2704_v15, %v2527_v14 }
 0xfec   : > { %v2047_v16 = vpop.f32.mrf.mxu0 }
 0xfed   : > { %v2063_v9 = vmul.f32 %v2056_v11, %v2056_v11  ;;  %v2048_v18 = vadd.f32 %v2527_v14, %v2047_v16 }
 0xfee   : > { %v2705_v8 = vpop.f32.mrf.mxu0 }
 0xfef   : > { %v2066_v19 = vmul.f32 %v2063_v9, %v2056_v11  ;;  %v2061_v20 = vmul.f32 %v2048_v18, %v2048_v18 }
 0xff0   : > { %v2050_v21 = vpop.f32.mrf.mxu0 }
 0xff1   : > { %v2069_v23 = vmul.f32 0.044715, %v2066_v19  ;;  %v2064_v28 = vmul.f32 %v2061_v20, %v2048_v18  ;;  %v2051_v29 = vadd.f32 %v2527_v14, %v2050_v21 }
 0xff3   : > { %v2072_v24 = vadd.f32 %v2069_v23, %v2056_v11  ;;  %v2067_v30 = vmul.f32 0.044715, %v2064_v28  ;;  %v2062_v31 = vmul.f32 %v2051_v29, %v2051_v29 }
 0xff5   : > { %v2075_v32 = vmul.f32 0.7978846, %v2072_v24  ;;  %v2070_v33 = vadd.f32 %v2067_v30, %v2048_v18  ;;  %v2065_v26 = vmul.f32 %v2062_v31, %v2051_v29 }
 0xff7   : > { %2913 = vtanh.f32 %v2075_v32  ;;  %v2073_v34 = vmul.f32 0.7978846, %v2070_v33  ;;  %v2068_v35 = vmul.f32 0.044715, %v2065_v26 }
 0xff9   : > { %2915 = vtanh.f32 %v2073_v34  ;;  %v2071_v36 = vadd.f32 %v2068_v35, %v2051_v29 }
 0xffb   : > { %v2074_v37 = vmul.f32 0.7978846, %v2071_v36 }
 0xffd   : > { %2917 = vtanh.f32 %v2074_v37 }
0x1004   : > { %v2914_v38 = vpop.eup %2913 }
0x1005   : > { %v2081_v17 = vadd.f32 1.0, %v2914_v38 }
0x1006   : > { %v2916_v39 = vpop.eup %2915 }
0x1007   : > { %v2079_v0 = vadd.f32 1.0, %v2916_v39  ;;  %v2084_v63 = vmul.f32 0.5, %v2081_v17 }
0x1009   : > { %v2082_v2 = vmul.f32 0.5, %v2079_v0  ;;  %v2087_v41 = vmul.f32 %v2084_v63, %v2056_v11 }
0x100a   : > { %v2918_v12 = vpop.eup %2917 }
0x100b   : > { %v2080_v3 = vadd.f32 1.0, %v2918_v12  ;;  %v2085_v42 = vmul.f32 %v2082_v2, %v2048_v18  ;;  %v2089_v44 = vpack.c.bf16 %v2087_v41, %v2087_v41 }
0x100d   : > { %v2083_v40 = vmul.f32 0.5, %v2080_v3 }
0x100f   : > { %v2086_v43 = vmul.f32 %v2083_v40, %v2051_v29 }
0x1011   : > { %v2088_v52 = vpack.c.bf16 %v2086_v43, %v2085_v42 }
0x1013   : > { %2714 = vmatprep.mubr.msk.bf16.mxu1 %vm2122_vm13, %v2088_v52 }
0x1014   : > { %2715 = vmatmul.mubr.msk.bf16.vlgmr.msra.gmra.mxu1 %vm2122_vm13, %v2089_v44 }
0x10d4   : > { %v2716_v45 = vpop.f32.mrf.mxu1 }
0x10d5   : > { %v2179_v47 = vadd.f32 %v2716_v45, %v3473_v27 }
0x10d6   : > { %v2163_v48 = vpop.f32.mrf.mxu1 }
0x10d7   : > { %v2189_v49 = vadd.f32 %v2538_v46, %v2179_v47  ;;  %v2177_v50 = vadd.f32 %v2163_v48, %v3471_v22 }
0x10d8   : > { %v2717_v51 = vpop.f32.mrf.mxu1 }
0x10d9   : > { %2192 = vst.msk [vmem:[#allocation2 + $0x10] sm:$0x1] %vm981_vm6, %v2189_v49  ;;  %v2187_v53 = vadd.f32 %v2538_v46, %v2177_v50 }
0x10da   : > { %v2166_v54 = vpop.f32.mrf.mxu1 }
0x10db   : > { %2190 = vst.msk [vmem:[#allocation2] sm:$0xff] %vm974_vm5, %v2187_v53  ;;  %v2178_v55 = vadd.f32 %v2166_v54, %v3478_v25  ;;  %2196 = sbr.rel (%p2539_p1) target bundleno = 4829 (0x12dd), region = 112 }
0x10dd   : > { %v2188_v56 = vadd.f32 %v2538_v46, %v2178_v55 }
0x10df   : > { %2191 = vst.msk [vmem:[#allocation2 + $0x8] sm:$0xff] %vm974_vm5, %v2188_v56 }
0x10e0   : > { %v2199_v27 = vsel %vm981_vm6, %v2187_v53, 0.0  ;;  %v2919_v25 = vld [vmem:[%s3673_s1 + $0x8] sm:$0xff]   ;;  %v3034_v61 = vmov 0.0   ;;  %vm3035_vm14 = vmmov 0   ;;  %v2920_v62 = vld [vmem:[%s3673_s1] sm:$0xff]  }
0x10e1   : > { %2200 = vadd.xlane.f32.xlu0 %v2199_v27  ;;  %2718 = vmatprep.subr.bf16.mxu0 %v3034_v61  ;;  %v2197_v7 = vld [vmem:[%s3674_s27] sm:$0x1] }
0x10e2   : > { %2722 = vmatprep.mubr.msk.bf16.mxu0 %vm3035_vm14, %v3034_v61  ;;  %2719 = vmatpush3.bf16.msra.mxu0 %v2919_v25  ;;  %v2198_v13 = vld [vmem:[%s3675_s26] sm:$0x1] }
0x10e3   : > { %2720 = vmatprep.subr.bf16.mxu0 %v3034_v61  ;;  %v2219_v16 = vld [vmem:[%s3676_s0] sm:$0x1] }
0x10e6   : > { %2721 = vmatpush3.bf16.msra.mxu0 %v2920_v62 }
0x116a   : > { %v2201_v57 = vpop.xlane.xlu0 %2200 }
0x116b   : > { %v2202_v22 = vmul.f32 0.03125, %v2201_v57 }
0x116d   : > { %v2203_v58 = vsub.f32 %v2187_v53, %v2202_v22 }
0x116f   : > { %v2204_v59 = vmul.f32 %v2203_v58, %v2203_v58 }
0x1171   : > { %v2205_v60 = vsel %vm981_vm6, %v2204_v59, 0.0 }
0x1172   : > { %2206 = vadd.xlane.f32.xlu0 %v2205_v60 }
0x11fb   : > { %v2207_v1 = vpop.xlane.xlu0 %2206 }
0x11fc   : > { %v2208_v4 = vmul.f32 0.03125, %v2207_v1 }
0x11fe   : > { %v2209_v5 = vadd.f32 1e-05, %v2208_v4 }
0x1200   : > { %2921 = vrsqrt.f32 %v2209_v5 }
0x120d   : > { %v2922_v6 = vpop.eup %2921 }
0x120e   : > { %v2211_v10 = vmul.f32 %v2922_v6, %v2203_v58 }
0x1210   : > { %v2212_v14 = vmul.f32 %v2211_v10, %v2197_v7 }
0x1212   : > { %v2213_v15 = vadd.f32 %v2212_v14, %v2198_v13 }
0x1214   : > { %v2214_v11 = vpack.c.bf16 %v2213_v15, %v2213_v15 }
0x1216   : > { %2723 = vmatmul.mubr.msk.bf16.vlgmr.msra.gmra.mxu0 %vm974_vm5, %v2214_v11 }
0x12d6   : > { %v2269_v9 = vpop.f32.mrf.mxu0 }
0x12d7   : > { %v2270_v18 = vadd.f32 %v2269_v9, %v2219_v16 }
0x12d8   : > { %v2724_v8 = vpop.f32.mrf.mxu0 }
0x12d9   : > { %2275 = vst [vmem:[%s3282_s18] sm:$0x1] %v2270_v18 }
0x12da   : > { %v2272_v19 = vpop.f32.mrf.mxu0 }
0x12dc   : > { %v2725_v20 = vpop.f32.mrf.mxu0 }
0x12dd PF: > { %s3677_s5 = sld [smem:[#allocation9_spill]]  ;;  %s2289_s7 = sshll.u32 %s3282_s18, 4  ;;  %s2290_s7 = int_to_ptr.vmem [resolvable:$true] %s2289_s7 }
0x12de   : > { %s3679_s23 = sld [smem:[#allocation30_spill]]  ;;  %s3680_s24 = sand.u32 1, %s2991_s25  }
0x12df   : > { %s2277_s20 = scalar_lea.sflag [#allocation4], %s3680_s24  ;;  %s2923_s27 = scalar_lea.vmem %s2290_s7, 16 }
0x12e0   : > { %p2924_p2 = scmp.ne.s32.totalorder %s2290_s7, %s2923_s27  ;;  %s3036_s28 = smov [#allocation3]  }
0x12e1   : > { %s2927_s29 = sshll.u32 %s3036_s28, 4  ;;  %s2928_s29 = int_to_ptr.vmem [resolvable:$false] %s2927_s29 }
0x12e2   : > { %p2925_p4 = pnand %p2924_p2, %p3196_p3  ;;  %s2929_s26 = scalar_lea.vmem %s2928_s29, 32 }
0x12e3   : > { %s2543_s22 = sshll.u32 %s3677_s5, 4  ;;  %p2930_p6 = scmp.lt.s32.totalorder %s2290_s7, %s2928_s29 }
0x12e4   : > { %s2287_s19 = scalar_lea.hbm %s3679_s23, %s2543_s22  ;;  %p2926_p5 = pneg %p2925_p4 }
0x12e5   : > { %p2931_p7 = scmp.lt.s32.totalorder %s2929_s26, %s2923_s27 }
0x12e7   : > { %p2932_p8 = por %p2931_p7, %p2930_p6 }
0x12e9   : > { %p2933_p10 = pnand %p2932_p8, %p2926_p5 }
0x12eb   : > { %2936 = shalt.err (!%p2933_p10)
}
0x12ec   : > { %s2937_s30 = scalar_lea.hbm %s2287_s19, 16  ;;  %s2941_s0 = scalar_lea.hbm %s3679_s23, 32 }
0x12ed   : > { %p2938_p11 = scmp.ne.s32.totalorder %s2287_s19, %s2937_s30  ;;  %p2942_p0 = scmp.lt.s32.totalorder %s2287_s19, %s3679_s23 }
0x12ee   : > { %p2943_p1 = scmp.lt.s32.totalorder %s2941_s0, %s2937_s30 }
0x12ef   : > { %p2939_p12 = pnand %p2938_p11, %p3196_p3 }
0x12f0   : > { %p2944_p2 = por %p2943_p1, %p2942_p0 }
0x12f1   : > { %p2940_p13 = pneg %p2939_p12 }
0x12f3   : > { %p2945_p4 = pnand %p2944_p2, %p2940_p13 }
0x12f5   : > { %2948 = shalt.err (!%p2945_p4)
}
0x12f6   : > { %2734 = dma.vmem_to_hbm [thread:$0]  (%p3196_p3), %s2290_s7, 16, %s2287_s19, %s2277_s20  }
0x12f7 PF: > { %s3681_s2 = sld [smem:[#allocation12_spill]] }
0x12f8   : > { %s3682_s21 = sld [smem:[#allocation6_spill]] }
0x12fd   : > { %p2740_p5 = scmp.ge.s32.totalorder %s3681_s2, 2 }
0x12fe   : > { %s2301_s27 = sand.u32 1, %s3682_s21  }
0x12ff   : > { %p2737_p6 = pnand %p2740_p5, %p3206_p9  ;;  %s2302_s28 = scalar_lea.sflag [#allocation4], %s2301_s27 }
0x1301   : > { %p2738_p7 = pneg %p2737_p6 }
0x1303   : > { %2982 = dma.done.wait (%p2738_p7), %s2302_s28, 16  }
0x1304   : > { %2984 = vsyncadd (%p2738_p7), %s2302_s28, 4294967280  ;;  %s34_s0 = sadd.s32 1, %s3681_s2   ;;  %s3684_s29 = sld [smem:[#allocation7_spill]] }
0x1305   : > { %p31_p8 = scmp.ge.s32.totalorder %s34_s0, 6   ;;  %s3685_s26 = sld [smem:[#allocation17_spill]] }
0x1306   : > { %s3686_s27 = sld [smem:[#allocation10_spill]]  ;;  %s3690_s2 = smov %s2991_s25 }
0x1307   : > { %s3687_s3 = sld [smem:[#allocation11_spill]] }
0x1308   : > { %s3688_s28 = sld [smem:[#allocation13_spill]] }
0x1309   : > { %s3689_s19 = sld [smem:[#allocation15_spill]] }
0x130a   : > { %s3691_s25 = smov %s3684_s29 }
0x130b   :  { %33 = sbr.rel (!%p31_p8) target bundleno = 19 (0x13), region = 183 }
0x130f   : > { %s3692_s29 = smov %s3689_s19 }
0x1310   :  { %2306 = vsyncpa [#allocation4], 1 }
0x1311   :  { %2308 = vsyncpa [#allocation4 + $0x1], 1 }

</bundles_post_ra>
